<compile_context>
chip_gen: v7x
topology: tpu7x:2x2x1
jax: 0.10.0
libtpu: 0.0.40
codegen_flags: <defaults>
</compile_context>

<pallas_src>
import functools
import math

import jax
import jax.numpy as jnp
from jax.experimental import pallas as pl
from jax.experimental.pallas import tpu as pltpu


def _mha_kernel(qm_ref, km_ref, vm_ref, qres_ref,
                wq_ref, bq_ref, wk_ref, bk_ref, wv_ref, bv_ref,
                wo_ref, bo_ref, gamma_ref, beta_ref,
                out_ref, acc_ref, *, eps):
    """One grid step = one (batch, head) pair.

    Grid = (b, h), h innermost ("arbitrary" reduction axis).  The output
    projection is accumulated across heads into the f32 VMEM scratch
    `acc_ref`; residual + LayerNorm run once on the last head.
    """
    f32 = jnp.float32
    bf16 = jnp.bfloat16
    head = pl.program_id(1)

    @pl.when(head == 0)
    def _():
        acc_ref[...] = jnp.zeros_like(acc_ref)

    # Per-head projections (K = d_model contraction).  The head split is done
    # by the BlockSpec on head-major weight slabs -> no in-kernel lane slices.
    # Softmax scale is already folded into wq/bq in the wrapper.
    qh = jnp.dot(qm_ref[...], wq_ref[...], preferred_element_type=f32) + bq_ref[...]
    kh = jnp.dot(km_ref[...], wk_ref[...], preferred_element_type=f32) + bk_ref[...]
    vh = jnp.dot(vm_ref[...], wv_ref[...], preferred_element_type=f32) + bv_ref[...]

    # Scores: contract d_k of both operands (no materialized K transpose).
    s = jax.lax.dot_general(qh.astype(bf16), kh.astype(bf16),
                            dimension_numbers=(((1,), (1,)), ((), ())),
                            preferred_element_type=f32)            # (nq, nk)

    # Numerically stable softmax, denominator reciprocal on the EUP.
    s = s - jnp.max(s, axis=-1, keepdims=True)
    p = jnp.exp(s)
    p = p * pl.reciprocal(jnp.sum(p, axis=-1, keepdims=True), approx=True)

    o_h = jnp.dot(p.astype(bf16), vh.astype(bf16),
                  preferred_element_type=f32)                       # (nq, d_v)

    # Output projection accumulated across the head grid axis.  At production
    # d_v (64–128) each accumulation contracts a reasonable MXU depth.
    acc_ref[...] += jnp.dot(o_h.astype(bf16), wo_ref[...],
                            preferred_element_type=f32)             # (nq, d_model)

    @pl.when(head == pl.num_programs(1) - 1)
    def _():
        # Dropout is identity in eval mode; shortcut residual uses the f32 Q.
        res = qres_ref[...] + acc_ref[...] + bo_ref[...]
        mean = jnp.mean(res, axis=-1, keepdims=True)
        cent = res - mean
        var = jnp.mean(cent * cent, axis=-1, keepdims=True)
        normed = cent * jax.lax.rsqrt(var + eps)
        out_ref[...] = (normed * gamma_ref[...] + beta_ref[...]).astype(out_ref.dtype)


def multi_head_attention(queries, keys, values, params, *, h, d_k, d_v, eps=1e-5):
    b, nq, d_model = queries.shape
    nk = keys.shape[1]
    wq, bq, wk, bk, wv, bv, wo, bo, gamma, beta = params

    bf16 = jnp.bfloat16
    scale = 1.0 / math.sqrt(d_k)

    # --- one-time parameter prep (layout plumbing, not runtime compute) -----
    # Head-major weight slabs (h, d_model, d_*) so the kernel's BlockSpec can
    # deliver exactly one head's weights per grid step, bf16 for the MXU.
    # Softmax scale folded into the Q projection (weights AND bias).
    wq_h = (wq * scale).reshape(d_model, h, d_k).transpose(1, 0, 2).astype(bf16)
    wk_h = wk.reshape(d_model, h, d_k).transpose(1, 0, 2).astype(bf16)
    wv_h = wv.reshape(d_model, h, d_v).transpose(1, 0, 2).astype(bf16)
    wo_h = wo.reshape(h, d_v, d_model).astype(bf16)          # rows already head-major
    bq_h = (bq * scale).reshape(h, 1, d_k)
    bk_h = bk.reshape(h, 1, d_k)
    bv_h = bv.reshape(h, 1, d_v)

    # bf16 matmul copies of the activations (half the HBM traffic); only the
    # residual copy of Q travels in f32.
    q_bf = queries.reshape(b * nq, d_model).astype(bf16)
    k_bf = keys.reshape(b * nk, d_model).astype(bf16)
    v_bf = values.reshape(b * nk, d_model).astype(bf16)
    q_res = queries.reshape(b * nq, d_model)

    kernel = functools.partial(_mha_kernel, eps=eps)

    # BlockSpecs.  Activation blocks depend only on the batch index -> they
    # stay resident across the inner head axis (no re-DMA per head).
    row_q = pl.BlockSpec((nq, d_model), lambda i, j: (i, 0))
    row_kv = pl.BlockSpec((nk, d_model), lambda i, j: (i, 0))

    def head_spec(a):   # one head's slab of a (h, ..., ...) parameter
        return pl.BlockSpec((None,) + tuple(a.shape[1:]), lambda i, j: (j, 0, 0))

    def const_spec(a):  # constant (broadcast) parameter block
        return pl.BlockSpec(tuple(a.shape), lambda i, j: (0, 0))

    grid_spec = pltpu.PrefetchScalarGridSpec(
        num_scalar_prefetch=0,
        grid=(b, h),
        in_specs=[row_q, row_kv, row_kv, row_q,
                  head_spec(wq_h), head_spec(bq_h),
                  head_spec(wk_h), head_spec(bk_h),
                  head_spec(wv_h), head_spec(bv_h),
                  head_spec(wo_h),
                  const_spec(bo), const_spec(gamma), const_spec(beta)],
        out_specs=pl.BlockSpec((nq, d_model), lambda i, j: (i, 0)),
        scratch_shapes=[pltpu.VMEM((nq, d_model), jnp.float32)],
    )

    out2 = pl.pallas_call(
        kernel,
        out_shape=jax.ShapeDtypeStruct((b * nq, d_model), queries.dtype),
        grid_spec=grid_spec,
        compiler_params=pltpu.CompilerParams(
            # batch axis "parallel" (v7x: 2 TensorCores split the batches),
            # head axis "arbitrary" (output-projection reduction).
            dimension_semantics=("parallel", "arbitrary"),
            vmem_limit_bytes=64 * 1024 * 1024),
    )(q_bf, k_bf, v_bf, q_res,
      wq_h, bq_h, wk_h, bk_h, wv_h, bv_h, wo_h, bo, gamma, beta)
    return out2.reshape(b, nq, d_model)


def _xavier_uniform(key, fan_in, fan_out):
    # Matches nn.init.xavier_uniform_ bound for a Linear(fan_in -> fan_out).
    bound = math.sqrt(6.0 / (fan_in + fan_out))
    # Stored as (in_features, out_features) for x @ W.
    return jax.random.uniform(key, (fan_in, fan_out), jnp.float32, -bound, bound)


def _reference(queries, keys, values, params, *, h, d_k, d_v, eps=1e-5):
    # Pure-JAX f32 reference mirroring the PyTorch module (eval mode).
    wq, bq, wk, bk, wv, bv, wo, bo, gamma, beta = params
    b, nq, dm = queries.shape
    nk = keys.shape[1]
    q = (queries @ wq + bq[0]).reshape(b, nq, h, d_k).transpose(0, 2, 1, 3)
    k = (keys @ wk + bk[0]).reshape(b, nk, h, d_k).transpose(0, 2, 3, 1)
    v = (values @ wv + bv[0]).reshape(b, nk, h, d_v).transpose(0, 2, 1, 3)
    att = (q @ k) / math.sqrt(d_k)
    att = jax.nn.softmax(att, axis=-1)
    out = (att @ v).transpose(0, 2, 1, 3).reshape(b, nq, h * d_v)
    out = out @ wo + bo[0]
    out = queries + out
    mean = out.mean(-1, keepdims=True)
    var = ((out - mean) ** 2).mean(-1, keepdims=True)
    return (out - mean) / jnp.sqrt(var + eps) * gamma[0] + beta[0]


if __name__ == "__main__":
    # Small config consistent with the module: d_model=32, d_k=d_v=8, h=4.
    b_s, nq, nk = 2, 8, 8
    d_model, d_k, d_v, h = 32, 8, 8, 4

    key = jax.random.PRNGKey(0)
    kq, kk, kv, ko, kwq, kwk, kwv = jax.random.split(key, 7)

    queries = jax.random.normal(kq, (b_s, nq, d_model), jnp.float32)
    keys = jax.random.normal(kk, (b_s, nk, d_model), jnp.float32)
    values = jax.random.normal(kv, (b_s, nk, d_model), jnp.float32)

    # Deterministic parameter init (Xavier-uniform weights, zero biases,
    # LayerNorm gamma=1 / beta=0), biases kept 2-D (1, features) for TPU layout.
    wq = _xavier_uniform(kwq, d_model, h * d_k)
    wk = _xavier_uniform(kwk, d_model, h * d_k)
    wv = _xavier_uniform(kwv, d_model, h * d_v)
    wo = _xavier_uniform(ko, h * d_v, d_model)
    bq = jnp.zeros((1, h * d_k), jnp.float32)
    bk = jnp.zeros((1, h * d_k), jnp.float32)
    bv = jnp.zeros((1, h * d_v), jnp.float32)
    bo = jnp.zeros((1, d_model), jnp.float32)
    gamma = jnp.ones((1, d_model), jnp.float32)
    beta = jnp.zeros((1, d_model), jnp.float32)

    params = (wq, bq, wk, bk, wv, bv, wo, bo, gamma, beta)

    out = multi_head_attention(queries, keys, values, params, h=h, d_k=d_k, d_v=d_v)
    out = jax.block_until_ready(out)

    ref = _reference(queries, keys, values, params, h=h, d_k=d_k, d_v=d_v)
    assert out.shape == (b_s, nq, d_model)
    # Tolerance loosened for bf16 matmul operands + approx EUP reciprocal.
    assert jnp.allclose(out, ref, atol=3e-2, rtol=3e-2), "mismatch vs reference"

    print("KERNEL_OK")
</pallas_src>

<mosaic_0001>
module attributes {stable_mosaic.version = 11 : i64} {
  func.func @_mha_kernel(%arg0: i32, %arg1: i32, %arg2: memref<8x32xbf16, #tpu.memory_space<vmem>>, %arg3: memref<8x32xbf16, #tpu.memory_space<vmem>>, %arg4: memref<8x32xbf16, #tpu.memory_space<vmem>>, %arg5: memref<8x32xf32, #tpu.memory_space<vmem>>, %arg6: memref<1x32x8xbf16, #tpu.memory_space<vmem>>, %arg7: memref<1x1x8xf32, #tpu.memory_space<vmem>>, %arg8: memref<1x32x8xbf16, #tpu.memory_space<vmem>>, %arg9: memref<1x1x8xf32, #tpu.memory_space<vmem>>, %arg10: memref<1x32x8xbf16, #tpu.memory_space<vmem>>, %arg11: memref<1x1x8xf32, #tpu.memory_space<vmem>>, %arg12: memref<1x8x32xbf16, #tpu.memory_space<vmem>>, %arg13: memref<1x32xf32, #tpu.memory_space<vmem>>, %arg14: memref<1x32xf32, #tpu.memory_space<vmem>>, %arg15: memref<1x32xf32, #tpu.memory_space<vmem>>, %arg16: memref<8x32xf32, #tpu.memory_space<vmem>>, %arg17: memref<8x32xf32, #tpu.memory_space<vmem>>) attributes {dimension_semantics = [#tpu.dimension_semantics<parallel>, #tpu.dimension_semantics<arbitrary>], iteration_bounds = array<i64: 2, 4>, scalar_prefetch = 0 : i64, scratch_operands = 1 : i64, tpu.core_type = #tpu.core_type<tc>, window_params = [{transform_indices = @transform_0, window_bounds = array<i64: 8, 32>}, {transform_indices = @transform_1, window_bounds = array<i64: 8, 32>}, {transform_indices = @transform_2, window_bounds = array<i64: 8, 32>}, {transform_indices = @transform_3, window_bounds = array<i64: 8, 32>}, {transform_indices = @transform_4, window_bounds = array<i64: 1, 32, 8>}, {transform_indices = @transform_5, window_bounds = array<i64: 1, 1, 8>}, {transform_indices = @transform_6, window_bounds = array<i64: 1, 32, 8>}, {transform_indices = @transform_7, window_bounds = array<i64: 1, 1, 8>}, {transform_indices = @transform_8, window_bounds = array<i64: 1, 32, 8>}, {transform_indices = @transform_9, window_bounds = array<i64: 1, 1, 8>}, {transform_indices = @transform_10, window_bounds = array<i64: 1, 8, 32>}, {pipeline_mode = #tpu.pipeline_mode<synchronous>, transform_indices = @transform_11, window_bounds = array<i64: 1, 32>}, {pipeline_mode = #tpu.pipeline_mode<synchronous>, transform_indices = @transform_12, window_bounds = array<i64: 1, 32>}, {pipeline_mode = #tpu.pipeline_mode<synchronous>, transform_indices = @transform_13, window_bounds = array<i64: 1, 32>}, {transform_indices = @transform_14, window_bounds = array<i64: 8, 32>}]} {
    %c0_i32 = arith.constant 0 : i32
    %0 = arith.cmpi eq, %arg1, %c0_i32 : i32
    %1 = arith.extui %0 : i1 to i32
    %c0_i32_0 = arith.constant 0 : i32
    %2 = arith.cmpi ne, %1, %c0_i32_0 : i32
    scf.if %2 {
      %cst_39 = arith.constant 0.000000e+00 : f32
      %53 = vector.broadcast %cst_39 : f32 to vector<8x32xf32>
      %c0_40 = arith.constant 0 : index
      %c0_41 = arith.constant 0 : index
      %54 = vector.load %arg17[%c0_40, %c0_41] : memref<8x32xf32, #tpu.memory_space<vmem>>, vector<8x32xf32>
      tpu.vector_store %arg17[%c0_40, %c0_41], %53 {strides = array<i32>} : memref<8x32xf32, #tpu.memory_space<vmem>>, vector<8x32xf32>,
    } else {
    }
    %c0 = arith.constant 0 : index
    %c0_1 = arith.constant 0 : index
    %3 = vector.load %arg2[%c0, %c0_1] : memref<8x32xbf16, #tpu.memory_space<vmem>>, vector<8x32xbf16>
    %c0_2 = arith.constant 0 : index
    %c0_3 = arith.constant 0 : index
    %c0_4 = arith.constant 0 : index
    %4 = vector.load %arg6[%c0_2, %c0_3, %c0_4] : memref<1x32x8xbf16, #tpu.memory_space<vmem>>, vector<1x32x8xbf16>
    %5 = vector.shape_cast %4 : vector<1x32x8xbf16> to vector<32x8xbf16>
    %cst = arith.constant dense<0.000000e+00> : vector<8x8xf32>
    %6 = tpu.matmul %3, %5, %cst {dimension_numbers = #tpu.dot_dimension_numbers<[1], [0], [0], [1], [0, 0, 1, 1], [], []>} : vector<8x32xbf16>, vector<32x8xbf16>, vector<8x8xf32> -> vector<8x8xf32>
    %c0_5 = arith.constant 0 : index
    %c0_6 = arith.constant 0 : index
    %c0_7 = arith.constant 0 : index
    %7 = vector.load %arg7[%c0_5, %c0_6, %c0_7] : memref<1x1x8xf32, #tpu.memory_space<vmem>>, vector<1x1x8xf32>
    %8 = vector.shape_cast %7 : vector<1x1x8xf32> to vector<1x8xf32>
    %9 = vector.broadcast %8 : vector<1x8xf32> to vector<8x8xf32>
    %10 = arith.addf %6, %9 : vector<8x8xf32>
    %c0_8 = arith.constant 0 : index
    %c0_9 = arith.constant 0 : index
    %11 = vector.load %arg3[%c0_8, %c0_9] : memref<8x32xbf16, #tpu.memory_space<vmem>>, vector<8x32xbf16>
    %c0_10 = arith.constant 0 : index
    %c0_11 = arith.constant 0 : index
    %c0_12 = arith.constant 0 : index
    %12 = vector.load %arg8[%c0_10, %c0_11, %c0_12] : memref<1x32x8xbf16, #tpu.memory_space<vmem>>, vector<1x32x8xbf16>
    %13 = vector.shape_cast %12 : vector<1x32x8xbf16> to vector<32x8xbf16>
    %cst_13 = arith.constant dense<0.000000e+00> : vector<8x8xf32>
    %14 = tpu.matmul %11, %13, %cst_13 {dimension_numbers = #tpu.dot_dimension_numbers<[1], [0], [0], [1], [0, 0, 1, 1], [], []>} : vector<8x32xbf16>, vector<32x8xbf16>, vector<8x8xf32> -> vector<8x8xf32>
    %c0_14 = arith.constant 0 : index
    %c0_15 = arith.constant 0 : index
    %c0_16 = arith.constant 0 : index
    %15 = vector.load %arg9[%c0_14, %c0_15, %c0_16] : memref<1x1x8xf32, #tpu.memory_space<vmem>>, vector<1x1x8xf32>
    %16 = vector.shape_cast %15 : vector<1x1x8xf32> to vector<1x8xf32>
    %17 = vector.broadcast %16 : vector<1x8xf32> to vector<8x8xf32>
    %18 = arith.addf %14, %17 : vector<8x8xf32>
    %c0_17 = arith.constant 0 : index
    %c0_18 = arith.constant 0 : index
    %19 = vector.load %arg4[%c0_17, %c0_18] : memref<8x32xbf16, #tpu.memory_space<vmem>>, vector<8x32xbf16>
    %c0_19 = arith.constant 0 : index
    %c0_20 = arith.constant 0 : index
    %c0_21 = arith.constant 0 : index
    %20 = vector.load %arg10[%c0_19, %c0_20, %c0_21] : memref<1x32x8xbf16, #tpu.memory_space<vmem>>, vector<1x32x8xbf16>
    %21 = vector.shape_cast %20 : vector<1x32x8xbf16> to vector<32x8xbf16>
    %cst_22 = arith.constant dense<0.000000e+00> : vector<8x8xf32>
    %22 = tpu.matmul %19, %21, %cst_22 {dimension_numbers = #tpu.dot_dimension_numbers<[1], [0], [0], [1], [0, 0, 1, 1], [], []>} : vector<8x32xbf16>, vector<32x8xbf16>, vector<8x8xf32> -> vector<8x8xf32>
    %c0_23 = arith.constant 0 : index
    %c0_24 = arith.constant 0 : index
    %c0_25 = arith.constant 0 : index
    %23 = vector.load %arg11[%c0_23, %c0_24, %c0_25] : memref<1x1x8xf32, #tpu.memory_space<vmem>>, vector<1x1x8xf32>
    %24 = vector.shape_cast %23 : vector<1x1x8xf32> to vector<1x8xf32>
    %25 = vector.broadcast %24 : vector<1x8xf32> to vector<8x8xf32>
    %26 = arith.addf %22, %25 : vector<8x8xf32>
    %27 = arith.truncf %10 : vector<8x8xf32> to vector<8x8xbf16>
    %28 = arith.truncf %18 : vector<8x8xf32> to vector<8x8xbf16>
    %cst_26 = arith.constant dense<0.000000e+00> : vector<8x8xf32>
    %29 = tpu.matmul %27, %28, %cst_26 {dimension_numbers = #tpu.dot_dimension_numbers<[1], [1], [0], [0], [0, 0, 1, 0], [], []>} : vector<8x8xbf16>, vector<8x8xbf16>, vector<8x8xf32> -> vector<8x8xf32>
    %cst_27 = arith.constant dense<0xFF800000> : vector<8xf32>
    %30 = vector.multi_reduction <maximumf>, %29, %cst_27 [1] : vector<8x8xf32> to vector<8xf32>
    %31 = vector.shape_cast %30 : vector<8xf32> to vector<8x1xf32>
    %32 = vector.broadcast %31 : vector<8x1xf32> to vector<8x8xf32>
    %33 = arith.subf %29, %32 : vector<8x8xf32>
    %34 = math.exp %33 : vector<8x8xf32>
    %cst_28 = arith.constant dense<0.000000e+00> : vector<8xf32>
    %35 = vector.multi_reduction <add>, %34, %cst_28 [1] : vector<8x8xf32> to vector<8xf32>
    %36 = vector.shape_cast %35 : vector<8xf32> to vector<8x1xf32>
    %37 = tpu.reciprocal %36 {approx = true} : vector<8x1xf32> -> vector<8x1xf32>
    %38 = vector.broadcast %37 : vector<8x1xf32> to vector<8x8xf32>
    %39 = arith.mulf %34, %38 : vector<8x8xf32>
    %40 = arith.truncf %39 : vector<8x8xf32> to vector<8x8xbf16>
    %41 = arith.truncf %26 : vector<8x8xf32> to vector<8x8xbf16>
    %cst_29 = arith.constant dense<0.000000e+00> : vector<8x8xf32>
    %42 = tpu.matmul %40, %41, %cst_29 {dimension_numbers = #tpu.dot_dimension_numbers<[1], [0], [0], [1], [0, 0, 1, 1], [], []>} : vector<8x8xbf16>, vector<8x8xbf16>, vector<8x8xf32> -> vector<8x8xf32>
    %c0_30 = arith.constant 0 : index
    %c0_31 = arith.constant 0 : index
    %43 = vector.load %arg17[%c0_30, %c0_31] : memref<8x32xf32, #tpu.memory_space<vmem>>, vector<8x32xf32>
    %44 = arith.truncf %42 : vector<8x8xf32> to vector<8x8xbf16>
    %c0_32 = arith.constant 0 : index
    %c0_33 = arith.constant 0 : index
    %c0_34 = arith.constant 0 : index
    %45 = vector.load %arg12[%c0_32, %c0_33, %c0_34] : memref<1x8x32xbf16, #tpu.memory_space<vmem>>, vector<1x8x32xbf16>
    %46 = vector.shape_cast %45 : vector<1x8x32xbf16> to vector<8x32xbf16>
    %cst_35 = arith.constant dense<0.000000e+00> : vector<8x32xf32>
    %47 = tpu.matmul %44, %46, %cst_35 {dimension_numbers = #tpu.dot_dimension_numbers<[1], [0], [0], [1], [0, 0, 1, 1], [], []>} : vector<8x8xbf16>, vector<8x32xbf16>, vector<8x32xf32> -> vector<8x32xf32>
    %48 = arith.addf %43, %47 : vector<8x32xf32>
    %c0_36 = arith.constant 0 : index
    %c0_37 = arith.constant 0 : index
    %49 = vector.load %arg17[%c0_36, %c0_37] : memref<8x32xf32, #tpu.memory_space<vmem>>, vector<8x32xf32>
    tpu.vector_store %arg17[%c0_36, %c0_37], %48 {strides = array<i32>} : memref<8x32xf32, #tpu.memory_space<vmem>>, vector<8x32xf32>,
    %c3_i32 = arith.constant 3 : i32
    %50 = arith.cmpi eq, %arg1, %c3_i32 : i32
    %51 = arith.extui %50 : i1 to i32
    %c0_i32_38 = arith.constant 0 : i32
    %52 = arith.cmpi ne, %51, %c0_i32_38 : i32
    scf.if %52 {
      %c0_39 = arith.constant 0 : index
      %c0_40 = arith.constant 0 : index
      %53 = vector.load %arg5[%c0_39, %c0_40] : memref<8x32xf32, #tpu.memory_space<vmem>>, vector<8x32xf32>
      %c0_41 = arith.constant 0 : index
      %c0_42 = arith.constant 0 : index
      %54 = vector.load %arg17[%c0_41, %c0_42] : memref<8x32xf32, #tpu.memory_space<vmem>>, vector<8x32xf32>
      %55 = arith.addf %53, %54 : vector<8x32xf32>
      %c0_43 = arith.constant 0 : index
      %c0_44 = arith.constant 0 : index
      %56 = vector.load %arg13[%c0_43, %c0_44] : memref<1x32xf32, #tpu.memory_space<vmem>>, vector<1x32xf32>
      %57 = vector.broadcast %56 : vector<1x32xf32> to vector<8x32xf32>
      %58 = arith.addf %55, %57 : vector<8x32xf32>
      %cst_45 = arith.constant dense<0.000000e+00> : vector<8xf32>
      %59 = vector.multi_reduction <add>, %58, %cst_45 [1] : vector<8x32xf32> to vector<8xf32>
      %60 = vector.shape_cast %59 : vector<8xf32> to vector<8x1xf32>
      %cst_46 = arith.constant 3.200000e+01 : f32
      %61 = vector.broadcast %cst_46 : f32 to vector<8x1xf32>
      %62 = arith.divf %60, %61 : vector<8x1xf32>
      %63 = vector.broadcast %62 : vector<8x1xf32> to vector<8x32xf32>
      %64 = arith.subf %58, %63 : vector<8x32xf32>
      %65 = arith.mulf %64, %64 : vector<8x32xf32>
      %cst_47 = arith.constant dense<0.000000e+00> : vector<8xf32>
      %66 = vector.multi_reduction <add>, %65, %cst_47 [1] : vector<8x32xf32> to vector<8xf32>
      %67 = vector.shape_cast %66 : vector<8xf32> to vector<8x1xf32>
      %cst_48 = arith.constant 3.200000e+01 : f32
      %68 = vector.broadcast %cst_48 : f32 to vector<8x1xf32>
      %69 = arith.divf %67, %68 : vector<8x1xf32>
      %cst_49 = arith.constant 9.99999974E-6 : f32
      %70 = vector.broadcast %cst_49 : f32 to vector<8x1xf32>
      %71 = arith.addf %69, %70 : vector<8x1xf32>
      %72 = math.rsqrt %71 : vector<8x1xf32>
      %73 = vector.broadcast %72 : vector<8x1xf32> to vector<8x32xf32>
      %74 = arith.mulf %64, %73 : vector<8x32xf32>
      %c0_50 = arith.constant 0 : index
      %c0_51 = arith.constant 0 : index
      %75 = vector.load %arg14[%c0_50, %c0_51] : memref<1x32xf32, #tpu.memory_space<vmem>>, vector<1x32xf32>
      %76 = vector.broadcast %75 : vector<1x32xf32> to vector<8x32xf32>
      %77 = arith.mulf %74, %76 : vector<8x32xf32>
      %c0_52 = arith.constant 0 : index
      %c0_53 = arith.constant 0 : index
      %78 = vector.load %arg15[%c0_52, %c0_53] : memref<1x32xf32, #tpu.memory_space<vmem>>, vector<1x32xf32>
      %79 = vector.broadcast %78 : vector<1x32xf32> to vector<8x32xf32>
      %80 = arith.addf %77, %79 : vector<8x32xf32>
      %c0_54 = arith.constant 0 : index
      %c0_55 = arith.constant 0 : index
      %81 = vector.load %arg16[%c0_54, %c0_55] : memref<8x32xf32, #tpu.memory_space<vmem>>, vector<8x32xf32>
      tpu.vector_store %arg16[%c0_54, %c0_55], %80 {strides = array<i32>} : memref<8x32xf32, #tpu.memory_space<vmem>>, vector<8x32xf32>,
    } else {
    }
    return
  }
  func.func @transform_0(%arg0: i32, %arg1: i32) -> (i32, i32) {
    %c0_i32 = arith.constant 0 : i32
    %c0_i32_0 = arith.constant 0 : i32
    return %arg0, %c0_i32 : i32, i32
  }
  func.func @transform_1(%arg0: i32, %arg1: i32) -> (i32, i32) {
    %c0_i32 = arith.constant 0 : i32
    %c0_i32_0 = arith.constant 0 : i32
    return %arg0, %c0_i32 : i32, i32
  }
  func.func @transform_2(%arg0: i32, %arg1: i32) -> (i32, i32) {
    %c0_i32 = arith.constant 0 : i32
    %c0_i32_0 = arith.constant 0 : i32
    return %arg0, %c0_i32 : i32, i32
  }
  func.func @transform_3(%arg0: i32, %arg1: i32) -> (i32, i32) {
    %c0_i32 = arith.constant 0 : i32
    %c0_i32_0 = arith.constant 0 : i32
    return %arg0, %c0_i32 : i32, i32
  }
  func.func @transform_4(%arg0: i32, %arg1: i32) -> (i32, i32, i32) {
    %c0_i32 = arith.constant 0 : i32
    %c0_i32_0 = arith.constant 0 : i32
    %c0_i32_1 = arith.constant 0 : i32
    return %arg1, %c0_i32, %c0_i32_0 : i32, i32, i32
  }
  func.func @transform_5(%arg0: i32, %arg1: i32) -> (i32, i32, i32) {
    %c0_i32 = arith.constant 0 : i32
    %c0_i32_0 = arith.constant 0 : i32
    %c0_i32_1 = arith.constant 0 : i32
    return %arg1, %c0_i32, %c0_i32_0 : i32, i32, i32
  }
  func.func @transform_6(%arg0: i32, %arg1: i32) -> (i32, i32, i32) {
    %c0_i32 = arith.constant 0 : i32
    %c0_i32_0 = arith.constant 0 : i32
    %c0_i32_1 = arith.constant 0 : i32
    return %arg1, %c0_i32, %c0_i32_0 : i32, i32, i32
  }
  func.func @transform_7(%arg0: i32, %arg1: i32) -> (i32, i32, i32) {
    %c0_i32 = arith.constant 0 : i32
    %c0_i32_0 = arith.constant 0 : i32
    %c0_i32_1 = arith.constant 0 : i32
    return %arg1, %c0_i32, %c0_i32_0 : i32, i32, i32
  }
  func.func @transform_8(%arg0: i32, %arg1: i32) -> (i32, i32, i32) {
    %c0_i32 = arith.constant 0 : i32
    %c0_i32_0 = arith.constant 0 : i32
    %c0_i32_1 = arith.constant 0 : i32
    return %arg1, %c0_i32, %c0_i32_0 : i32, i32, i32
  }
  func.func @transform_9(%arg0: i32, %arg1: i32) -> (i32, i32, i32) {
    %c0_i32 = arith.constant 0 : i32
    %c0_i32_0 = arith.constant 0 : i32
    %c0_i32_1 = arith.constant 0 : i32
    return %arg1, %c0_i32, %c0_i32_0 : i32, i32, i32
  }
  func.func @transform_10(%arg0: i32, %arg1: i32) -> (i32, i32, i32) {
    %c0_i32 = arith.constant 0 : i32
    %c0_i32_0 = arith.constant 0 : i32
    %c0_i32_1 = arith.constant 0 : i32
    return %arg1, %c0_i32, %c0_i32_0 : i32, i32, i32
  }
  func.func @transform_11(%arg0: i32, %arg1: i32) -> (i32, i32) {
    %c0_i32 = arith.constant 0 : i32
    %c0_i32_0 = arith.constant 0 : i32
    %c0_i32_1 = arith.constant 0 : i32
    return %c0_i32, %c0_i32_0 : i32, i32
  }
  func.func @transform_12(%arg0: i32, %arg1: i32) -> (i32, i32) {
    %c0_i32 = arith.constant 0 : i32
    %c0_i32_0 = arith.constant 0 : i32
    %c0_i32_1 = arith.constant 0 : i32
    return %c0_i32, %c0_i32_0 : i32, i32
  }
  func.func @transform_13(%arg0: i32, %arg1: i32) -> (i32, i32) {
    %c0_i32 = arith.constant 0 : i32
    %c0_i32_0 = arith.constant 0 : i32
    %c0_i32_1 = arith.constant 0 : i32
    return %c0_i32, %c0_i32_0 : i32, i32
  }
  func.func @transform_14(%arg0: i32, %arg1: i32) -> (i32, i32) {
    %c0_i32 = arith.constant 0 : i32
    %c0_i32_0 = arith.constant 0 : i32
    return %arg0, %c0_i32 : i32, i32
  }
}

</mosaic_0001>

<bundles_post_ra>
// kernel: tpu_custom_call.1
= control target key start
LH: loop header
LB: loop body
LE: loop exit
PB: predicated region body
PF: predicated region fallthrough
CT: control target
= control target key end

     0   :  { %s3385_s0 = inlined_call_operand.hbm [shape: bf16[16,32], index: 0, kind: input, shape index: {}]   ;;  %s3386_s1 = inlined_call_operand.hbm [shape: bf16[16,32], index: 1, kind: input, shape index: {}]   ;;  %s3387_s2 = inlined_call_operand.hbm [shape: bf16[16,32], index: 2, kind: input, shape index: {}]   ;;  %s3388_s3 = inlined_call_operand.hbm [shape: f32[16,32], index: 3, kind: input, shape index: {}]   ;;  %s3389_s4 = inlined_call_operand.hbm [shape: bf16[4,32,8], index: 4, kind: input, shape index: {}]   ;;  %s3390_s5 = inlined_call_operand.hbm [shape: f32[4,1,8], index: 5, kind: input, shape index: {}]   ;;  %s3391_s6 = inlined_call_operand.hbm [shape: bf16[4,32,8], index: 6, kind: input, shape index: {}]   ;;  %s3392_s7 = inlined_call_operand.hbm [shape: f32[4,1,8], index: 7, kind: input, shape index: {}]   ;;  %s3393_s8 = inlined_call_operand.hbm [shape: bf16[4,32,8], index: 8, kind: input, shape index: {}]   ;;  %s3394_s9 = inlined_call_operand.hbm [shape: f32[4,1,8], index: 9, kind: input, shape index: {}]   ;;  %s3395_s10 = inlined_call_operand.hbm [shape: bf16[4,8,32], index: 10, kind: input, shape index: {}]   ;;  %s3396_s11 = inlined_call_operand.hbm [shape: f32[1,32], index: 11, kind: input, shape index: {}]   ;;  %s3397_s12 = inlined_call_operand.hbm [shape: f32[1,32], index: 12, kind: input, shape index: {}]   ;;  %s3398_s13 = inlined_call_operand.hbm [shape: f32[1,32], index: 13, kind: input, shape index: {}]   ;;  %s3399_s14 = inlined_call_operand.hbm [shape: f32[16,32], index: 14, kind: output, shape index: {}]  }
   0x1   :  { %3451 = sst [smem:[#allocation53_spill]] %s3385_s0 }
   0x2   :  { %3452 = sst [smem:[#allocation54_spill]] %s3386_s1 }
   0x3   :  { %3453 = sst [smem:[#allocation55_spill]] %s3387_s2 }
   0x4   :  { %3454 = sst [smem:[#allocation56_spill]] %s3388_s3 }
   0x5   :  { %3455 = sst [smem:[#allocation57_spill]] %s3389_s4 }
   0x6   :  { %3456 = sst [smem:[#allocation58_spill]] %s3390_s5 }
   0x7   :  { %3457 = sst [smem:[#allocation59_spill]] %s3391_s6 }
   0x8   :  { %3458 = sst [smem:[#allocation60_spill]] %s3392_s7 }
   0x9   :  { %3459 = sst [smem:[#allocation61_spill]] %s3393_s8 }
   0xa   :  { %3460 = sst [smem:[#allocation62_spill]] %s3394_s9 }
   0xb   :  { %3461 = sst [smem:[#allocation63_spill]] %s3395_s10 }
   0xc   :  { %3462 = sst [smem:[#allocation64_spill]] %s3396_s11 }
   0xd   :  { %3463 = sst [smem:[#allocation65_spill]] %s3397_s12 }
   0xe   :  { %3464 = sst [smem:[#allocation66_spill]] %s3399_s14 }
   0xf   :  { %19 = vsyncpa [#allocation4], 0 }
  0x10   :  { %21 = vsyncpa [#allocation4 + $0x1], 0 }
  0x11   :  { %22 = vsyncpa [#allocation7], 0 }
  0x12   :  { %24 = vsyncpa [#allocation7 + $0x1], 0 }
  0x13   :  { %25 = vsyncpa [#allocation10], 0 }
  0x14   :  { %27 = vsyncpa [#allocation10 + $0x1], 0 }
  0x15   :  { %28 = vsyncpa [#allocation13], 0 }
  0x16   :  { %30 = vsyncpa [#allocation13 + $0x1], 0 }
  0x17   :  { %31 = vsyncpa [#allocation16], 0 }
  0x18   :  { %33 = vsyncpa [#allocation16 + $0x1], 0 }
  0x19   :  { %34 = vsyncpa [#allocation19], 0 }
  0x1a   :  { %36 = vsyncpa [#allocation19 + $0x1], 0 }
  0x1b   :  { %37 = vsyncpa [#allocation22], 0 }
  0x1c   :  { %38 = vsyncpa [#allocation25], 0 }
  0x1d   :  { %39 = vsyncpa [#allocation5], 0 }
  0x1e   :  { %41 = vsyncpa [#allocation5 + $0x1], 0  ;;  %s2624_s29 = smov 0   ;;  %s2626_s30 = smov 0  }
  0x1f   :  { %s2628_s15 = smov 0   ;;  %s2630_s16 = smov 0  }
  0x20   :  { %s2632_s17 = smov 0   ;;  %s2634_s18 = smov 0  }
  0x21   :  { %s2636_s19 = smov 0   ;;  %s2638_s20 = smov 0  }
  0x22   :  { %s2640_s21 = smov 0   ;;  %s2642_s22 = smov 0  }
  0x23   :  { %s2644_s23 = smov 0  }
  0x24 LB: > { %3465 = sst [smem:[#allocation37_spill]] %s2499_s16  ;;  %s2678_s24 = sadd.s32 4294967295, %s2527_s23   ;;  %s2527_s23 = sphi %s2644_s23, %s47_s23   ;;  %s2523_s22 = sphi %s2642_s22, %s3562_s22   ;;  %s2519_s21 = sphi %s2640_s21, %s3569_s21   ;;  %s2515_s20 = sphi %s2638_s20, %s3560_s20   ;;  %s2511_s19 = sphi %s2636_s19, %s3568_s19   ;;  %s2507_s18 = sphi %s2634_s18, %s3567_s18   ;;  %s2503_s17 = sphi %s2632_s17, %s3566_s17   ;;  %s2499_s16 = sphi %s2630_s16, %s3558_s16   ;;  %s2495_s15 = sphi %s2628_s15, %s3565_s15   ;;  %s2491_s30 = sphi %s2626_s30, %s3564_s30   ;;  %s2487_s29 = sphi %s2624_s29, %s3563_s29  }
  0x25   : > { %3466 = sst [smem:[#allocation38_spill]] %s2503_s17  ;;  %s1634_s25 = sadd.s32 4294967294, %s2527_s23  }
  0x26   : > { %3467 = sst [smem:[#allocation39_spill]] %s2511_s19  ;;  %p79_p0 = scmp.ne.s32.totalorder %s2503_s17, %s2499_s16 }
  0x27   : > { %3468 = sst [smem:[#allocation40_spill]] %s2515_s20  ;;  %p3409_p1 = scmp.eq.s32.totalorder %s2678_s24, 0 }
  0x28   : > { %3469 = sst [smem:[#allocation41_spill]] %s2523_s22  ;;  %p183_p2 = scmp.ne.s32.totalorder %s2491_s30, %s2487_s29 }
  0x29   : > { %3470 = sst [smem:[#allocation42_spill]] %s2527_s23  ;;  %p2688_p4 = por %p3409_p1, %p79_p0 }
  0x2a   : > { %3471 = sst [smem:[#allocation43_spill]] %s2678_s24  ;;  %p432_p5 = scmp.eq.s32.totalorder %s1634_s25, 7 }
  0x2b   : > { %s3472_s26 = scalar_select %p2688_p4, 1, 0 }
  0x2c   : > { %p2694_p6 = por %p183_p2, %p3409_p1  ;;  %p1635_p7 = scmp.ge.s32.totalorder %s2527_s23, 1 }
  0x2d   : > { %3473 = sst [smem:[#allocation44_spill]] %s3472_s26  ;;  %p2699_p8 = por %p432_p5, %p79_p0 }
  0x2e   : > { %s3474_s27 = scalar_select %p2694_p6, 1, 0 }
  0x2f   : > { %s3476_s28 = scalar_select %p2699_p8, 1, 0 }
  0x30   : > { %3475 = sst [smem:[#allocation45_spill]] %s3474_s27  ;;  %p439_p9 = scmp.lt.s32.totalorder %s2527_s23, 9 }
  0x31   : > { %3477 = sst [smem:[#allocation46_spill]] %s3476_s28  ;;  %s2529_s16 = smov [#allocation21]  }
  0x32   : > { %p2704_p10 = pnand %p1635_p7, %p439_p9  ;;  %s452_s14 = sshll.u32 %s2529_s16, 4  ;;  %s453_s14 = int_to_ptr.vmem [resolvable:$true] %s452_s14 }
  0x33   : > { %s3481_s11 = sld [smem:[#allocation64_spill]] }
  0x34   : > { %s3478_s29 = scalar_select %p2704_p10, 1, 0 }
  0x35   : > { %p1795_p11 = pneg %p2704_p10 }
  0x36   : > { %3479 = sst [smem:[#allocation47_spill]] %s3478_s29 }
  0x37   : > { %p2712_p12 = pnand %p1795_p11, %p3409_p1 }
  0x39   : > { %s3480_s25 = scalar_select %p2712_p12, 1, 0 }
  0x3a   : > { %s1959_s26 = scalar_lea.hbm %s3481_s11, 16  ;;  %p2728_p2 = pneg %p2712_p12 }
  0x3b   : > { %p1960_p0 = scmp.ne.s32.totalorder %s3481_s11, %s1959_s26  ;;  %p1966_p9 = scmp.lt.u32.totalorder %s1959_s26, %s3481_s11 }
  0x3c   : > { %s3482_s16 = scalar_select %p2728_p2, 1, 0 }
  0x3d   : > { %p1962_p5 = pnand %p2728_p2, %p1960_p0 }
  0x3f   : > { %p1963_p7 = pneg %p1962_p5 }
  0x41   : > { %p1968_p11 = pnand %p1966_p9, %p1963_p7 }
  0x43   : > { %1971 = shalt.err (!%p1968_p11)
}
  0x44   : > { %s1972_s27 = scalar_lea.vmem %s453_s14, 16  ;;  %s1979_s8 = scalar_lea.vmem %s453_s14, 32 }
  0x45   : > { %p1973_p1 = scmp.ne.s32.totalorder %s453_s14, %s1972_s27  ;;  %p1980_p8 = scmp.lt.s32.totalorder %s453_s14, %s453_s14 }
  0x46   : > { %p1981_p6 = scmp.lt.s32.totalorder %s1979_s8, %s1972_s27 }
  0x47   : > { %p1975_p3 = pnand %p1973_p1, %p2728_p2 }
  0x48   : > { %p1982_p4 = por %p1981_p6, %p1980_p8 }
  0x49   : > { %p1976_p13 = pneg %p1975_p3 }
  0x4b   : > { %p1983_p10 = pnand %p1982_p4, %p1976_p13 }
  0x4d   : > { %1986 = shalt.err (!%p1983_p10)
}
  0x4e   : > { %1798 = dma.hbm_to_vmem [thread:$0]  (!%p2712_p12), %s3481_s11, 16, %s453_s14, [#allocation22]  }
  0x4f   : > { %p3423_p1 = scmp.eq.s32.totalorder %s2527_s23, 0  ;;  %p3483_p3 = scmp.ne.s32.totalorder %s2507_s18, %s2503_s17 }
  0x50   : > { %p3484_p4 = scmp.eq.s32.totalorder %s2678_s24, 7  ;;  %p3422_p8 = scmp.lt.s32.totalorder %s2527_s23, 8 }
  0x51   : > { %s2756_s20 = sand.u32 1, %s2507_s18   ;;  %p3487_p10 = pmov %p3483_p3 }
  0x52   : > { %p2750_p6 = por %p3484_p4, %p3483_p3  ;;  %s2764_s26 = sshll.u32 %s2756_s20, 2 }
  0x53   : > { %p75_p13 = por %p3423_p1, %p3487_p10  ;;  %3488 = sst [smem:[#allocation49_spill]] %s2764_s26 }
  0x54   : > { %s3485_s19 = scalar_select %p2750_p6, 1, 0 }
  0x55   : > { %s2767_s27 = sshll.u32 %s2523_s22, 6  ;;  %s2770_s14 = sand.u32 1, %s2527_s23  }
  0x56   : > { %3486 = sst [smem:[#allocation48_spill]] %s3485_s19  ;;  %p2774_p0 = pnand %p3422_p8, %p75_p13 }
  0x57   : > { %s3490_s1 = sld [smem:[#allocation54_spill]]  ;;  %s507_s19 = scalar_lea.vmem [#allocation6], %s2764_s26 }
  0x58   : > { %s3489_s8 = scalar_select %p2774_p0, 1, 0 }
  0x59   : > { %s514_s24 = sshll.u32 %s507_s19, 4  ;;  %p2792_p7 = pneg %p2774_p0  ;;  %s2785_s24 = int_to_ptr.vmem [resolvable:$true] %s514_s24 }
  0x5b   : > { %s3491_s6 = scalar_select %p2792_p7, 1, 0 }
  0x5d   : > { %s2782_s11 = scalar_lea.hbm %s3490_s1, %s2767_s27  ;;  %s1992_s4 = scalar_lea.hbm %s3490_s1, 128 }
  0x5e   : > { %s1987_s29 = scalar_lea.hbm %s2782_s11, 64  ;;  %p1993_p3 = scmp.lt.u32.totalorder %s2782_s11, %s3490_s1 }
  0x5f   : > { %p1988_p5 = scmp.ne.s32.totalorder %s2782_s11, %s1987_s29  ;;  %p1994_p4 = scmp.lt.u32.totalorder %s1992_s4, %s1987_s29 }
  0x60   : > { %p1996_p13 = scmp.lt.u32.totalorder %s1987_s29, %s2782_s11 }
  0x61   : > { %p1990_p9 = pnand %p2792_p7, %p1988_p5  ;;  %p1995_p10 = por %p1994_p4, %p1993_p3 }
  0x63   : > { %p1991_p11 = pneg %p1990_p9  ;;  %p1997_p8 = por %p1996_p13, %p1995_p10 }
  0x65   : > { %p1998_p1 = pnand %p1997_p8, %p1991_p11 }
  0x67   : > { %2001 = shalt.err (!%p1998_p1)
}
  0x68   : > { %s2002_s17 = scalar_lea.vmem %s2785_s24, 64  ;;  %s2530_s10 = smov [#allocation6]  }
  0x69   : > { %p2003_p5 = scmp.ne.s32.totalorder %s2785_s24, %s2002_s17  ;;  %s2007_s28 = sshll.u32 %s2530_s10, 4  ;;  %s2008_s28 = int_to_ptr.vmem [resolvable:$false] %s2007_s28 }
  0x6a   : > { %s2009_s2 = scalar_lea.vmem %s2008_s28, 128  ;;  %p2010_p12 = scmp.lt.s32.totalorder %s2785_s24, %s2008_s28 }
  0x6b   : > { %p2005_p9 = pnand %p2003_p5, %p2792_p7  ;;  %p2011_p2 = scmp.lt.s32.totalorder %s2009_s2, %s2002_s17 }
  0x6d   : > { %p2006_p6 = pneg %p2005_p9  ;;  %p2012_p3 = por %p2011_p2, %p2010_p12 }
  0x6f   : > { %p2013_p4 = pnand %p2012_p3, %p2006_p6 }
  0x71   : > { %2016 = shalt.err (!%p2013_p4)
}
  0x72   : > { %s3492_s4 = scalar_lea.sflag [#allocation7], %s2770_s14  ;;  %s1646_s29 = sshll.u32 %s2756_s20, 3 }
  0x73   : > { %1811 = dma.hbm_to_vmem [thread:$0]  (!%p2774_p0), %s2782_s11, 64, %s2785_s24, %s3492_s4  }
  0x74   : > { %s1647_s19 = sshll.u32 %s2523_s22, 7  ;;  %s3493_s3 = sld [smem:[#allocation56_spill]] }
  0x75   : > { %s543_s28 = scalar_lea.vmem [#allocation9], %s1646_s29  ;;  %s3434_s0 = scalar_lea.sflag [#allocation10], %s2770_s14 }
  0x76   : > { %s550_s2 = sshll.u32 %s543_s28, 4  ;;  %s551_s2 = int_to_ptr.vmem [resolvable:$true] %s550_s2 }
  0x7a   : > { %s2822_s17 = scalar_lea.hbm %s3493_s3, %s1647_s19  ;;  %s2022_s4 = scalar_lea.hbm %s3493_s3, 256 }
  0x7b   : > { %s2017_s26 = scalar_lea.hbm %s2822_s17, 128  ;;  %p2023_p6 = scmp.lt.u32.totalorder %s2822_s17, %s3493_s3 }
  0x7c   : > { %p2018_p12 = scmp.ne.s32.totalorder %s2822_s17, %s2017_s26  ;;  %p2024_p8 = scmp.lt.u32.totalorder %s2022_s4, %s2017_s26 }
  0x7d   : > { %p2026_p10 = scmp.lt.u32.totalorder %s2017_s26, %s2822_s17 }
  0x7e   : > { %p2020_p2 = pnand %p2018_p12, %p2792_p7  ;;  %p2025_p11 = por %p2024_p8, %p2023_p6 }
  0x80   : > { %p2021_p1 = pneg %p2020_p2  ;;  %p2027_p13 = por %p2026_p10, %p2025_p11 }
  0x82   : > { %p2028_p5 = pnand %p2027_p13, %p2021_p1 }
  0x84   : > { %2031 = shalt.err (!%p2028_p5)
}
  0x85   : > { %s2032_s29 = scalar_lea.vmem %s551_s2, 128  ;;  %s2531_s10 = smov [#allocation9]  }
  0x86   : > { %p2033_p9 = scmp.ne.s32.totalorder %s551_s2, %s2032_s29  ;;  %s2037_s28 = sshll.u32 %s2531_s10, 4  ;;  %s2038_s28 = int_to_ptr.vmem [resolvable:$false] %s2037_s28 }
  0x87   : > { %s2039_s11 = scalar_lea.vmem %s2038_s28, 256  ;;  %p2040_p12 = scmp.lt.s32.totalorder %s551_s2, %s2038_s28 }
  0x88   : > { %p2035_p3 = pnand %p2033_p9, %p2792_p7  ;;  %p2041_p2 = scmp.lt.s32.totalorder %s2039_s11, %s2032_s29 }
  0x8a   : > { %p2036_p4 = pneg %p2035_p3  ;;  %p2042_p0 = por %p2041_p2, %p2040_p12 }
  0x8c   : > { %p2043_p6 = pnand %p2042_p0, %p2036_p4 }
  0x8e   : > { %2046 = shalt.err (!%p2043_p6)
}
  0x8f   : > { %p3494_p8 = scmp.ne.s32.totalorder %s3489_s8, 0  ;;  %s56_s26 = sadd.s32 1, %s2519_s21 }
  0x90   : > { %s170_s24 = sadd.s32 1, %s2495_s15  ;;  %p57_p0 = scmp.ge.s32.totalorder %s56_s26, 4 }
  0x91   : > { %1817 = dma.hbm_to_vmem [thread:$0]  (!%p3494_p8), %s2822_s17, 128, %s551_s2, %s3434_s0  }
  0x92   : > { %p177_p1 = scmp.ne.s32.totalorder %s2495_s15, %s2491_s30  ;;  %s2849_s4 = sand.u32 1, %s2495_s15  }
  0x93   : > { %s3571_s26 = smov (%p57_p0, %s56_s26), 0  ;;  %s3496_s1 = sadd.s32 1, %s2523_s22 }
  0x94   : > { %3495 = sst [smem:[#allocation50_spill]] %s3571_s26  ;;  %s3573_s1 = smov (!%p57_p0, %s3496_s1), %s2523_s22 }
  0x95   : > { %s167_s19 = ssub.s32 %s2519_s21, %s3571_s26  ;;  %p3497_p11 = scmp.eq.s32.totalorder %s2527_s23, 0 }
  0x96   : > { %p61_p13 = scmp.ge.s32.totalorder %s3573_s1, 2  ;;  %p168_p5 = scmp.eq.s32.totalorder %s167_s19, 0 }
  0x97   : > { %p179_p10 = por %p177_p1, %p3497_p11  ;;  %p3498_p9 = scmp.lt.s32.totalorder %s2527_s23, 8 }
  0x98   : > { %s3575_s1 = smov (%p61_p13, %s3573_s1), 0  ;;  %s2874_s10 = sshll.u32 %s2519_s21, 4 }
  0x99   : > { %p2862_p3 = pnand %p3498_p9, %p179_p10  ;;  %3500 = sst [smem:[#allocation51_spill]] %s3575_s1 }
  0x9a   : > { %s2869_s2 = scalar_select %p168_p5, %s2495_s15, %s170_s24  }
  0x9b   : > { %s3499_s17 = scalar_select %p2862_p3, 1, 0 }
  0x9c   : > { %s63_s29 = ssub.s32 %s2523_s22, %s3575_s1  ;;  %s3501_s5 = sld [smem:[#allocation58_spill]] }
  0x9d   : > { %p64_p4 = scmp.eq.s32.totalorder %s63_s29, 0  ;;  %s581_s0 = scalar_lea.vmem [#allocation12], %s2849_s4 }
  0x9e   : > { %s588_s3 = sshll.u32 %s581_s0, 4  ;;  %s3502_s26 = sadd.s32 1, %s2507_s18  ;;  %s2888_s3 = int_to_ptr.vmem [resolvable:$true] %s588_s3 }
  0x9f   : > { %s2886_s23 = scalar_select %p64_p4, %s2507_s18, %s3502_s26  }
  0xa0   : > { %p2895_p2 = pneg %p2862_p3 }
  0xa1   : > { %3503 = sst [smem:[#allocation52_spill]] %s2886_s23 }
  0xa2   : > { %s2880_s19 = scalar_lea.hbm %s3501_s5, %s2874_s10  ;;  %s2052_s0 = scalar_lea.hbm %s3501_s5, 64 }
  0xa3   : > { %s2047_s29 = scalar_lea.hbm %s2880_s19, 16  ;;  %p2053_p1 = scmp.lt.u32.totalorder %s2880_s19, %s3501_s5 }
  0xa4   : > { %p2048_p12 = scmp.ne.s32.totalorder %s2880_s19, %s2047_s29  ;;  %p2054_p11 = scmp.lt.u32.totalorder %s2052_s0, %s2047_s29 }
  0xa5   : > { %s3504_s1 = scalar_select %p2895_p2, 1, 0 }
  0xa6   : > { %p2050_p6 = pnand %p2895_p2, %p2048_p12  ;;  %p2055_p10 = por %p2054_p11, %p2053_p1 }
  0xa7   : > { %p2056_p13 = scmp.lt.u32.totalorder %s2047_s29, %s2880_s19 }
  0xa8   : > { %p2051_p0 = pneg %p2050_p6 }
  0xa9   : > { %p2057_p5 = por %p2056_p13, %p2055_p10 }
  0xab   : > { %p2058_p9 = pnand %p2057_p5, %p2051_p0 }
  0xad   : > { %2061 = shalt.err (!%p2058_p9)
}
  0xae   : > { %s2062_s24 = scalar_lea.vmem %s2888_s3, 16  ;;  %s2532_s28 = smov [#allocation12]  }
  0xaf   : > { %p2063_p4 = scmp.ne.s32.totalorder %s2888_s3, %s2062_s24  ;;  %s2067_s11 = sshll.u32 %s2532_s28, 4  ;;  %s2068_s11 = int_to_ptr.vmem [resolvable:$false] %s2067_s11 }
  0xb0   : > { %s2069_s22 = scalar_lea.vmem %s2068_s11, 32  ;;  %p2070_p8 = scmp.lt.s32.totalorder %s2888_s3, %s2068_s11 }
  0xb1   : > { %p2065_p12 = pnand %p2063_p4, %p2895_p2  ;;  %p2071_p7 = scmp.lt.s32.totalorder %s2069_s22, %s2062_s24 }
  0xb3   : > { %p2066_p6 = pneg %p2065_p12  ;;  %p2072_p1 = por %p2071_p7, %p2070_p8 }
  0xb5   : > { %p2073_p11 = pnand %p2072_p1, %p2066_p6 }
  0xb7   : > { %2076 = shalt.err (!%p2073_p11)
}
  0xb8   : > { %s3505_s29 = scalar_lea.sflag [#allocation13], %s2770_s14  ;;  %s3506_s7 = sld [smem:[#allocation60_spill]] }
  0xb9   : > { %1823 = dma.hbm_to_vmem [thread:$0]  (!%p2862_p3), %s2880_s19, 16, %s2888_s3, %s3505_s29  }
  0xba   : > { %s619_s24 = scalar_lea.vmem [#allocation15], %s2849_s4 }
  0xbb   : > { %s626_s11 = sshll.u32 %s619_s24, 4  ;;  %s627_s11 = int_to_ptr.vmem [resolvable:$true] %s626_s11 }
  0xbe   : > { %s2924_s28 = scalar_lea.hbm %s3506_s7, %s2874_s10  ;;  %s2082_s19 = scalar_lea.hbm %s3506_s7, 64 }
  0xbf   : > { %s2077_s5 = scalar_lea.hbm %s2924_s28, 16  ;;  %p2083_p10 = scmp.lt.u32.totalorder %s2924_s28, %s3506_s7 }
  0xc0   : > { %p2078_p7 = scmp.ne.s32.totalorder %s2924_s28, %s2077_s5  ;;  %p2084_p13 = scmp.lt.u32.totalorder %s2082_s19, %s2077_s5 }
  0xc1   : > { %p2086_p9 = scmp.lt.u32.totalorder %s2077_s5, %s2924_s28 }
  0xc2   : > { %p2080_p8 = pnand %p2078_p7, %p2895_p2  ;;  %p2085_p5 = por %p2084_p13, %p2083_p10 }
  0xc4   : > { %p2081_p0 = pneg %p2080_p8  ;;  %p2087_p4 = por %p2086_p9, %p2085_p5 }
  0xc6   : > { %p2088_p12 = pnand %p2087_p4, %p2081_p0 }
  0xc8   : > { %2091 = shalt.err (!%p2088_p12)
}
  0xc9   : > { %s2092_s26 = scalar_lea.vmem %s627_s11, 16  ;;  %s2533_s24 = smov [#allocation15]  }
  0xca   : > { %p2093_p6 = scmp.ne.s32.totalorder %s627_s11, %s2092_s26  ;;  %s2097_s22 = sshll.u32 %s2533_s24, 4  ;;  %s2098_s22 = int_to_ptr.vmem [resolvable:$false] %s2097_s22 }
  0xcb   : > { %s2099_s23 = scalar_lea.vmem %s2098_s22, 32  ;;  %p2100_p7 = scmp.lt.s32.totalorder %s627_s11, %s2098_s22 }
  0xcc   : > { %p2095_p1 = pnand %p2093_p6, %p2895_p2  ;;  %p2101_p8 = scmp.lt.s32.totalorder %s2099_s23, %s2092_s26 }
  0xce   : > { %p2096_p11 = pneg %p2095_p1  ;;  %p2102_p3 = por %p2101_p8, %p2100_p7 }
  0xd0   : > { %p2103_p10 = pnand %p2102_p3, %p2096_p11 }
  0xd2   : > { %2106 = shalt.err (!%p2103_p10)
}
  0xd3   : > { %p3507_p13 = scmp.ne.s32.totalorder %s3499_s17, 0  ;;  %s3508_s5 = scalar_lea.sflag [#allocation16], %s2770_s14 }
  0xd4   : > { %s3509_s9 = sld [smem:[#allocation62_spill]]  ;;  %s657_s22 = scalar_lea.vmem [#allocation18], %s2849_s4 }
  0xd5   : > { %1829 = dma.hbm_to_vmem [thread:$0]  (!%p3507_p13), %s2924_s28, 16, %s627_s11, %s3508_s5  }
  0xd6   : > { %s664_s0 = sshll.u32 %s657_s22, 4  ;;  %s3446_s26 = scalar_lea.sflag [#allocation19], %s2770_s14  ;;  %s665_s0 = int_to_ptr.vmem [resolvable:$true] %s664_s0 }
  0xda   : > { %s2951_s29 = scalar_lea.hbm %s3509_s9, %s2874_s10  ;;  %s2112_s11 = scalar_lea.hbm %s3509_s9, 64 }
  0xdb   : > { %s2107_s24 = scalar_lea.hbm %s2951_s29, 16  ;;  %p2113_p9 = scmp.lt.u32.totalorder %s2951_s29, %s3509_s9 }
  0xdc   : > { %p2108_p3 = scmp.ne.s32.totalorder %s2951_s29, %s2107_s24  ;;  %p2114_p4 = scmp.lt.u32.totalorder %s2112_s11, %s2107_s24 }
  0xdd   : > { %p2116_p6 = scmp.lt.u32.totalorder %s2107_s24, %s2951_s29 }
  0xde   : > { %p2110_p0 = pnand %p2108_p3, %p2895_p2  ;;  %p2115_p12 = por %p2114_p4, %p2113_p9 }
  0xe0   : > { %p2111_p5 = pneg %p2110_p0  ;;  %p2117_p1 = por %p2116_p6, %p2115_p12 }
  0xe2   : > { %p2118_p11 = pnand %p2117_p1, %p2111_p5 }
  0xe4   : > { %2121 = shalt.err (!%p2118_p11)
}
  0xe5   : > { %s2122_s3 = scalar_lea.vmem %s665_s0, 16  ;;  %s2534_s19 = smov [#allocation18]  }
  0xe6   : > { %p2123_p7 = scmp.ne.s32.totalorder %s665_s0, %s2122_s3  ;;  %s2127_s22 = sshll.u32 %s2534_s19, 4  ;;  %s2128_s22 = int_to_ptr.vmem [resolvable:$false] %s2127_s22 }
  0xe7   : > { %s2129_s23 = scalar_lea.vmem %s2128_s22, 32  ;;  %p2130_p3 = scmp.lt.s32.totalorder %s665_s0, %s2128_s22 }
  0xe8   : > { %p2125_p8 = pnand %p2123_p7, %p2895_p2  ;;  %p2131_p0 = scmp.lt.s32.totalorder %s2129_s23, %s2122_s3 }
  0xea   : > { %p2126_p10 = pneg %p2125_p8  ;;  %p2132_p13 = por %p2131_p0, %p2130_p3 }
  0xec   : > { %p2133_p4 = pnand %p2132_p13, %p2126_p10 }
  0xee   : > { %2136 = shalt.err (!%p2133_p4)
}
  0xef   : > { %p3510_p9 = scmp.ne.s32.totalorder %s3499_s17, 0  ;;  %s2535_s24 = smov [#allocation23]  }
  0xf0   : > { %s463_s28 = sshll.u32 %s2535_s24, 4  ;;  %s2536_s11 = smov [#allocation24]   ;;  %s464_s28 = int_to_ptr.vmem [resolvable:$true] %s463_s28 }
  0xf1   : > { %1835 = dma.hbm_to_vmem [thread:$0]  (!%p3510_p9), %s2951_s29, 16, %s665_s0, %s3446_s26  }
  0xf2   : > { %s474_s5 = sshll.u32 %s2536_s11, 4  ;;  %s3511_s12 = sld [smem:[#allocation65_spill]]  ;;  %s475_s5 = int_to_ptr.vmem [resolvable:$true] %s474_s5 }
  0xf3   : > { %p3512_p5 = scmp.ne.s32.totalorder %s3482_s16, 0 }
  0xf8   : > { %s2137_s22 = scalar_lea.hbm %s3511_s12, 16 }
  0xf9   : > { %p2138_p13 = scmp.ne.s32.totalorder %s3511_s12, %s2137_s22  ;;  %p2144_p1 = scmp.lt.u32.totalorder %s2137_s22, %s3511_s12 }
  0xfb   : > { %p2140_p12 = pnand %p2138_p13, %p3512_p5 }
  0xfd   : > { %p2141_p6 = pneg %p2140_p12 }
  0xff   : > { %p2146_p11 = pnand %p2144_p1, %p2141_p6 }
 0x101   : > { %2149 = shalt.err (!%p2146_p11)
}
 0x102   : > { %s2150_s29 = scalar_lea.vmem %s464_s28, 16  ;;  %s2157_s0 = scalar_lea.vmem %s464_s28, 32 }
 0x103   : > { %p2151_p7 = scmp.ne.s32.totalorder %s464_s28, %s2150_s29  ;;  %p2158_p3 = scmp.lt.s32.totalorder %s464_s28, %s464_s28 }
 0x104   : > { %p2159_p0 = scmp.lt.s32.totalorder %s2157_s0, %s2150_s29 }
 0x105   : > { %p2153_p8 = pnand %p2151_p7, %p3512_p5 }
 0x106   : > { %p2160_p4 = por %p2159_p0, %p2158_p3 }
 0x107   : > { %p2154_p10 = pneg %p2153_p8 }
 0x109   : > { %p2161_p9 = pnand %p2160_p4, %p2154_p10 }
 0x10b   : > { %2164 = shalt.err (!%p2161_p9)
}
 0x10c   : > { %p3513_p13 = scmp.ne.s32.totalorder %s3480_s25, 0  ;;  %s2165_s10 = scalar_lea.hbm %s3398_s13, 16 }
 0x10d   : > { %p2166_p12 = scmp.ne.s32.totalorder %s3398_s13, %s2165_s10  ;;  %p2172_p9 = scmp.lt.u32.totalorder %s2165_s10, %s3398_s13 }
 0x10e   : > { %1801 = dma.hbm_to_vmem [thread:$0]  (!%p3513_p13), %s3511_s12, 16, %s464_s28, [#allocation22]  }
 0x10f   : > { %p2168_p6 = pnand %p2166_p12, %p3512_p5 }
 0x111   : > { %p2169_p1 = pneg %p2168_p6 }
 0x113   : > { %p2174_p11 = pnand %p2172_p9, %p2169_p1 }
 0x115   : > { %2177 = shalt.err (!%p2174_p11)
}
 0x116   : > { %s2178_s29 = scalar_lea.vmem %s475_s5, 16  ;;  %s2185_s28 = scalar_lea.vmem %s475_s5, 32 }
 0x117   : > { %p2179_p7 = scmp.ne.s32.totalorder %s475_s5, %s2178_s29  ;;  %p2186_p3 = scmp.lt.s32.totalorder %s475_s5, %s475_s5 }
 0x118   : > { %p2187_p0 = scmp.lt.s32.totalorder %s2185_s28, %s2178_s29 }
 0x119   : > { %p2181_p8 = pnand %p2179_p7, %p3512_p5 }
 0x11a   : > { %p2188_p4 = por %p2187_p0, %p2186_p3 }
 0x11b   : > { %p2182_p10 = pneg %p2181_p8 }
 0x11d   : > { %p2189_p2 = pnand %p2188_p4, %p2182_p10 }
 0x11f   : > { %2192 = shalt.err (!%p2189_p2)
}
 0x120   : > { %s3514_s11 = sld [smem:[#allocation49_spill]]  ;;  %s3515_s9 = sld [smem:[#allocation53_spill]] }
 0x121   : > { %1804 = dma.hbm_to_vmem [thread:$0]  (!%p3513_p13), %s3398_s13, 16, %s475_s5, [#allocation25]  }
 0x122   : > { %s3516_s23 = sld [smem:[#allocation55_spill]]  ;;  %s486_s0 = scalar_lea.sflag [#allocation4], %s2756_s20 }
 0x123   : > { %p3518_p5 = scmp.ne.s32.totalorder %s3491_s6, 0 }
 0x126   : > { %s3014_s10 = scalar_lea.hbm %s3515_s9, %s2767_s27  ;;  %s489_s19 = scalar_lea.vmem [#allocation3], %s3514_s11 }
 0x127   : > { %s496_s25 = sshll.u32 %s489_s19, 4  ;;  %s2193_s5 = scalar_lea.hbm %s3014_s10, 64  ;;  %s3017_s25 = int_to_ptr.vmem [resolvable:$true] %s496_s25 }
 0x128   : > { %s3517_s28 = smov %s3516_s23  ;;  %s3023_s29 = scalar_lea.hbm %s3516_s23, %s2767_s27 }
 0x129   : > { %p2194_p2 = scmp.ne.s32.totalorder %s3014_s10, %s2193_s5  ;;  %s2198_s7 = scalar_lea.hbm %s3515_s9, 128 }
 0x12a   : > { %p2199_p6 = scmp.lt.u32.totalorder %s3014_s10, %s3515_s9  ;;  %p2200_p1 = scmp.lt.u32.totalorder %s2198_s7, %s2193_s5 }
 0x12b   : > { %p2196_p13 = pnand %p2194_p2, %p3518_p5  ;;  %p2202_p11 = scmp.lt.u32.totalorder %s2193_s5, %s3014_s10 }
 0x12c   : > { %p2201_p9 = por %p2200_p1, %p2199_p6 }
 0x12d   : > { %p2197_p12 = pneg %p2196_p13 }
 0x12e   : > { %p2203_p7 = por %p2202_p11, %p2201_p9 }
 0x130   : > { %p2204_p8 = pnand %p2203_p7, %p2197_p12 }
 0x132   : > { %2207 = shalt.err (!%p2204_p8)
}
 0x133   : > { %s2208_s20 = scalar_lea.vmem %s3017_s25, 64  ;;  %s2537_s27 = smov [#allocation3]  }
 0x134   : > { %p2209_p10 = scmp.ne.s32.totalorder %s3017_s25, %s2208_s20  ;;  %s2213_s19 = sshll.u32 %s2537_s27, 4  ;;  %s2214_s19 = int_to_ptr.vmem [resolvable:$false] %s2213_s19 }
 0x135   : > { %s2215_s12 = scalar_lea.vmem %s2214_s19, 128  ;;  %p2216_p4 = scmp.lt.s32.totalorder %s3017_s25, %s2214_s19 }
 0x136   : > { %p2211_p3 = pnand %p2209_p10, %p3518_p5  ;;  %p2217_p2 = scmp.lt.s32.totalorder %s2215_s12, %s2208_s20 }
 0x138   : > { %p2212_p0 = pneg %p2211_p3  ;;  %p2218_p13 = por %p2217_p2, %p2216_p4 }
 0x13a   : > { %p2219_p6 = pnand %p2218_p13, %p2212_p0 }
 0x13c   : > { %2222 = shalt.err (!%p2219_p6)
}
 0x13d   : > { %p3519_p12 = scmp.ne.s32.totalorder %s3489_s8, 0  ;;  %s525_s26 = scalar_lea.vmem [#allocation8], %s3514_s11 }
 0x13e   : > { %s532_s22 = sshll.u32 %s525_s26, 4  ;;  %s3049_s3 = sshll.u32 %s2849_s4, 4  ;;  %s533_s22 = int_to_ptr.vmem [resolvable:$true] %s532_s22 }
 0x13f   : > { %1808 = dma.hbm_to_vmem [thread:$0]  (!%p3519_p12), %s3014_s10, 64, %s3017_s25, %s486_s0  }
 0x140   : > { %s2223_s23 = scalar_lea.hbm %s3023_s29, 64  ;;  %s2228_s16 = scalar_lea.hbm %s3517_s28, 128 }
 0x141   : > { %p2224_p1 = scmp.ne.s32.totalorder %s3023_s29, %s2223_s23  ;;  %p2229_p7 = scmp.lt.u32.totalorder %s3023_s29, %s3517_s28 }
 0x142   : > { %p2230_p8 = scmp.lt.u32.totalorder %s2228_s16, %s2223_s23  ;;  %p2232_p3 = scmp.lt.u32.totalorder %s2223_s23, %s3023_s29 }
 0x143   : > { %p2226_p9 = pnand %p2224_p1, %p3518_p5 }
 0x144   : > { %p2231_p10 = por %p2230_p8, %p2229_p7 }
 0x145   : > { %p2227_p11 = pneg %p2226_p9 }
 0x146   : > { %p2233_p0 = por %p2232_p3, %p2231_p10 }
 0x148   : > { %p2234_p4 = pnand %p2233_p0, %p2227_p11 }
 0x14a   : > { %2237 = shalt.err (!%p2234_p4)
}
 0x14b   : > { %s2238_s11 = scalar_lea.vmem %s533_s22, 64  ;;  %s2538_s10 = smov [#allocation8]  }
 0x14c   : > { %p2239_p2 = scmp.ne.s32.totalorder %s533_s22, %s2238_s11  ;;  %s2243_s25 = sshll.u32 %s2538_s10, 4  ;;  %s2244_s25 = int_to_ptr.vmem [resolvable:$false] %s2243_s25 }
 0x14d   : > { %s2245_s0 = scalar_lea.vmem %s2244_s25, 128  ;;  %p2246_p1 = scmp.lt.s32.totalorder %s533_s22, %s2244_s25 }
 0x14e   : > { %p2241_p13 = pnand %p2239_p2, %p3518_p5  ;;  %p2247_p9 = scmp.lt.s32.totalorder %s2245_s0, %s2238_s11 }
 0x150   : > { %p2242_p6 = pneg %p2241_p13  ;;  %p2248_p12 = por %p2247_p9, %p2246_p1 }
 0x152   : > { %p2249_p7 = pnand %p2248_p12, %p2242_p6 }
 0x154   : > { %2252 = shalt.err (!%p2249_p7)
}
 0x155   : > { %p3520_p8 = scmp.ne.s32.totalorder %s3489_s8, 0  ;;  %s3521_s27 = scalar_lea.sflag [#allocation7], %s2770_s14 }
 0x156   : > { %s3071_s6 = sshll.u32 %s2519_s21, 8  ;;  %s561_s19 = scalar_lea.vmem [#allocation11], %s3049_s3 }
 0x157   : > { %1814 = dma.hbm_to_vmem [thread:$0]  (!%p3520_p8), %s3023_s29, 64, %s533_s22, %s3521_s27  }
 0x158   : > { %s568_s12 = sshll.u32 %s561_s19, 4  ;;  %s3522_s5 = sld [smem:[#allocation57_spill]]  ;;  %s3080_s12 = int_to_ptr.vmem [resolvable:$true] %s568_s12 }
 0x159   : > { %p3523_p12 = scmp.ne.s32.totalorder %s3504_s1, 0 }
 0x15e   : > { %s3078_s24 = scalar_lea.hbm %s3522_s5, %s3071_s6  ;;  %s2258_s16 = scalar_lea.hbm %s3522_s5, 1024 }
 0x15f   : > { %s2253_s8 = scalar_lea.hbm %s3078_s24, 256  ;;  %p2259_p3 = scmp.lt.u32.totalorder %s3078_s24, %s3522_s5 }
 0x160   : > { %p2254_p5 = scmp.ne.s32.totalorder %s3078_s24, %s2253_s8  ;;  %p2260_p0 = scmp.lt.u32.totalorder %s2258_s16, %s2253_s8 }
 0x161   : > { %p2262_p2 = scmp.lt.u32.totalorder %s2253_s8, %s3078_s24 }
 0x162   : > { %p2256_p11 = pnand %p2254_p5, %p3523_p12  ;;  %p2261_p4 = por %p2260_p0, %p2259_p3 }
 0x164   : > { %p2257_p10 = pneg %p2256_p11  ;;  %p2263_p13 = por %p2262_p2, %p2261_p4 }
 0x166   : > { %p2264_p6 = pnand %p2263_p13, %p2257_p10 }
 0x168   : > { %2267 = shalt.err (!%p2264_p6)
}
 0x169   : > { %s2268_s11 = scalar_lea.vmem %s3080_s12, 256  ;;  %s2539_s10 = smov [#allocation11]  }
 0x16a   : > { %p2269_p1 = scmp.ne.s32.totalorder %s3080_s12, %s2268_s11  ;;  %s2273_s25 = sshll.u32 %s2539_s10, 4  ;;  %s2274_s25 = int_to_ptr.vmem [resolvable:$false] %s2273_s25 }
 0x16b   : > { %s2275_s0 = scalar_lea.vmem %s2274_s25, 512  ;;  %p2276_p8 = scmp.lt.s32.totalorder %s3080_s12, %s2274_s25 }
 0x16c   : > { %p2271_p9 = pnand %p2269_p1, %p3523_p12  ;;  %p2277_p5 = scmp.lt.s32.totalorder %s2275_s0, %s2268_s11 }
 0x16e   : > { %p2272_p7 = pneg %p2271_p9  ;;  %p2278_p11 = por %p2277_p5, %p2276_p8 }
 0x170   : > { %p2279_p3 = pnand %p2278_p11, %p2272_p7 }
 0x172   : > { %2282 = shalt.err (!%p2279_p3)
}
 0x173   : > { %s2540_s27 = smov 64   ;;  %s2541_s19 = smov 4  }
 0x174   : > { %p3524_p10 = scmp.ne.s32.totalorder %s3499_s17, 0  ;;  %s3525_s26 = scalar_lea.sflag [#allocation10], %s2770_s14 }
 0x175   : > { %s3526_s29 = sld [smem:[#allocation59_spill]]  ;;  %s599_s16 = scalar_lea.vmem [#allocation14], %s3049_s3 }
 0x176   : > { %1820 = dma.hbm_to_vmem [thread:$0]  (!%p3524_p10), %s3078_s24, 256, %s3080_s12, %s3525_s26, %s2540_s27, %s2540_s27, %s2541_s19  }
 0x177   : > { %s606_s20 = sshll.u32 %s599_s16, 4  ;;  %s3528_s25 = sld [smem:[#allocation61_spill]]  ;;  %s3115_s20 = int_to_ptr.vmem [resolvable:$true] %s606_s20 }
 0x17b   : > { %s3527_s7 = smov %s3526_s29  ;;  %s3112_s22 = scalar_lea.hbm %s3526_s29, %s3071_s6 }
 0x17c   : > { %s2283_s5 = scalar_lea.hbm %s3112_s22, 256  ;;  %s2288_s26 = scalar_lea.hbm %s3527_s7, 1024 }
 0x17d   : > { %s3121_s0 = scalar_lea.hbm %s3528_s25, %s3071_s6  ;;  %p2284_p0 = scmp.ne.s32.totalorder %s3112_s22, %s2283_s5 }
 0x17e   : > { %p2289_p13 = scmp.lt.u32.totalorder %s3112_s22, %s3527_s7  ;;  %p2290_p6 = scmp.lt.u32.totalorder %s2288_s26, %s2283_s5 }
 0x17f   : > { %p2286_p4 = pnand %p2284_p0, %p3523_p12  ;;  %p2292_p9 = scmp.lt.u32.totalorder %s2283_s5, %s3112_s22 }
 0x180   : > { %p2291_p1 = por %p2290_p6, %p2289_p13 }
 0x181   : > { %p2287_p2 = pneg %p2286_p4 }
 0x182   : > { %p2293_p7 = por %p2292_p9, %p2291_p1 }
 0x184   : > { %p2294_p8 = pnand %p2293_p7, %p2287_p2 }
 0x186   : > { %2297 = shalt.err (!%p2294_p8)
}
 0x187   : > { %s2298_s6 = scalar_lea.vmem %s3115_s20, 256  ;;  %s2542_s29 = smov [#allocation14]  }
 0x188   : > { %p2299_p5 = scmp.ne.s32.totalorder %s3115_s20, %s2298_s6  ;;  %s2303_s16 = sshll.u32 %s2542_s29, 4  ;;  %s2304_s16 = int_to_ptr.vmem [resolvable:$false] %s2303_s16 }
 0x189   : > { %s2305_s11 = scalar_lea.vmem %s2304_s16, 512  ;;  %p2306_p0 = scmp.lt.s32.totalorder %s3115_s20, %s2304_s16 }
 0x18a   : > { %p2301_p11 = pnand %p2299_p5, %p3523_p12  ;;  %p2307_p4 = scmp.lt.s32.totalorder %s2305_s11, %s2298_s6 }
 0x18c   : > { %p2302_p3 = pneg %p2301_p11  ;;  %p2308_p13 = por %p2307_p4, %p2306_p0 }
 0x18e   : > { %p2309_p6 = pnand %p2308_p13, %p2302_p3 }
 0x190   : > { %2312 = shalt.err (!%p2309_p6)
}
 0x191   : > { %s3529_s5 = scalar_lea.sflag [#allocation13], %s2770_s14  ;;  %s637_s10 = scalar_lea.vmem [#allocation17], %s3049_s3 }
 0x192   : > { %1826 = dma.hbm_to_vmem [thread:$0]  (!%p3524_p10), %s3112_s22, 256, %s3115_s20, %s3529_s5, %s2540_s27, %s2540_s27, %s2541_s19  }
 0x193   : > { %s644_s12 = sshll.u32 %s637_s10, 4  ;;  %s1660_s24 = sshll.u32 %s2849_s4, 2  ;;  %s3151_s12 = int_to_ptr.vmem [resolvable:$true] %s644_s12 }
 0x194   : > { %s2313_s26 = scalar_lea.hbm %s3121_s0, 256  ;;  %s2318_s6 = scalar_lea.hbm %s3528_s25, 1024 }
 0x195   : > { %p2314_p2 = scmp.ne.s32.totalorder %s3121_s0, %s2313_s26  ;;  %p2319_p7 = scmp.lt.u32.totalorder %s3121_s0, %s3528_s25 }
 0x196   : > { %p2320_p8 = scmp.lt.u32.totalorder %s2318_s6, %s2313_s26  ;;  %p2322_p11 = scmp.lt.u32.totalorder %s2313_s26, %s3121_s0 }
 0x197   : > { %p2316_p1 = pnand %p2314_p2, %p3523_p12 }
 0x198   : > { %p2321_p5 = por %p2320_p8, %p2319_p7 }
 0x199   : > { %p2317_p9 = pneg %p2316_p1 }
 0x19a   : > { %p2323_p3 = por %p2322_p11, %p2321_p5 }
 0x19c   : > { %p2324_p0 = pnand %p2323_p3, %p2317_p9 }
 0x19e   : > { %2327 = shalt.err (!%p2324_p0)
}
 0x19f   : > { %s2328_s3 = scalar_lea.vmem %s3151_s12, 256  ;;  %s2543_s22 = smov [#allocation17]  }
 0x1a0   : > { %p2329_p4 = scmp.ne.s32.totalorder %s3151_s12, %s2328_s3  ;;  %s2333_s20 = sshll.u32 %s2543_s22, 4  ;;  %s2334_s20 = int_to_ptr.vmem [resolvable:$false] %s2333_s20 }
 0x1a1   : > { %s2335_s11 = scalar_lea.vmem %s2334_s20, 512  ;;  %p2336_p2 = scmp.lt.s32.totalorder %s3151_s12, %s2334_s20 }
 0x1a2   : > { %p2331_p13 = pnand %p2329_p4, %p3523_p12  ;;  %p2337_p1 = scmp.lt.s32.totalorder %s2335_s11, %s2328_s3 }
 0x1a4   : > { %p2332_p6 = pneg %p2331_p13  ;;  %p2338_p7 = por %p2337_p1, %p2336_p2 }
 0x1a6   : > { %p2339_p8 = pnand %p2338_p7, %p2332_p6 }
 0x1a8   : > { %2342 = shalt.err (!%p2339_p8)
}
 0x1a9   : > { %s3530_s5 = scalar_lea.sflag [#allocation16], %s2770_s14  ;;  %s1661_s10 = sshll.u32 %s2519_s21, 6 }
 0x1aa   : > { %1832 = dma.hbm_to_vmem [thread:$0]  (!%p3524_p10), %s3121_s0, 256, %s3151_s12, %s3530_s5, %s2540_s27, %s2540_s27, %s2541_s19  }
 0x1ab   : > { %s675_s26 = scalar_lea.vmem [#allocation20], %s1660_s24  ;;  %s3531_s29 = sld [smem:[#allocation63_spill]] }
 0x1ac   : > { %s682_s23 = sshll.u32 %s675_s26, 4  ;;  %s683_s23 = int_to_ptr.vmem [resolvable:$true] %s682_s23 }
 0x1b1   : > { %s3532_s3 = smov %s3531_s29  ;;  %s680_s16 = scalar_lea.hbm %s3531_s29, %s1661_s10 }
 0x1b2   : > { %s2343_s22 = scalar_lea.hbm %s680_s16, 64  ;;  %s2348_s7 = scalar_lea.hbm %s3532_s3, 256 }
 0x1b3   : > { %p2344_p9 = scmp.ne.s32.totalorder %s680_s16, %s2343_s22  ;;  %p2349_p3 = scmp.lt.u32.totalorder %s680_s16, %s3532_s3 }
 0x1b4   : > { %p2350_p0 = scmp.lt.u32.totalorder %s2348_s7, %s2343_s22  ;;  %p2352_p13 = scmp.lt.u32.totalorder %s2343_s22, %s680_s16 }
 0x1b5   : > { %p2346_p5 = pnand %p2344_p9, %p3523_p12 }
 0x1b6   : > { %p2351_p4 = por %p2350_p0, %p2349_p3 }
 0x1b7   : > { %p2347_p11 = pneg %p2346_p5 }
 0x1b8   : > { %p2353_p6 = por %p2352_p13, %p2351_p4 }
 0x1ba   : > { %p2354_p2 = pnand %p2353_p6, %p2347_p11 }
 0x1bc   : > { %2357 = shalt.err (!%p2354_p2)
}
 0x1bd   : > { %s2358_s4 = scalar_lea.vmem %s683_s23, 64  ;;  %s2544_s19 = smov [#allocation20]  }
 0x1be   : > { %p2359_p1 = scmp.ne.s32.totalorder %s683_s23, %s2358_s4  ;;  %s2363_s0 = sshll.u32 %s2544_s19, 4  ;;  %s2364_s0 = int_to_ptr.vmem [resolvable:$false] %s2363_s0 }
 0x1bf   : > { %s2365_s12 = scalar_lea.vmem %s2364_s0, 128  ;;  %p2366_p9 = scmp.lt.s32.totalorder %s683_s23, %s2364_s0 }
 0x1c0   : > { %p2361_p7 = pnand %p2359_p1, %p3523_p12  ;;  %p2367_p5 = scmp.lt.s32.totalorder %s2365_s12, %s2358_s4 }
 0x1c2   : > { %p2362_p8 = pneg %p2361_p7  ;;  %p2368_p10 = por %p2367_p5, %p2366_p9 }
 0x1c4   : > { %p2369_p0 = pnand %p2368_p10, %p2362_p8 }
 0x1c6   : > { %2372 = shalt.err (!%p2369_p0)
}
 0x1c7   : > { %p3533_p3 = scmp.ne.s32.totalorder %s3499_s17, 0  ;;  %s3534_s9 = scalar_lea.sflag [#allocation19], %s2770_s14 }
 0x1c8   : > { %s3535_s7 = sld [smem:[#allocation47_spill]] }
 0x1c9   : > { %1838 = dma.hbm_to_vmem [thread:$0]  (!%p3533_p3), %s680_s16, 64, %s683_s23, %s3534_s9  }
 0x1ce   : > { %p3536_p11 = scmp.ne.s32.totalorder %s3535_s7, 0 }
 0x1cf   : > { %s3537_s1 = sld [smem:[#allocation38_spill]] (!%p3536_p11)  ;;  %s3538_s24 = sld [smem:[#allocation44_spill]] (!%p3536_p11) }
 0x1d0   : > { %691 = sbr.rel (%p3536_p11) target bundleno = 2065 (0x811), region = 76 }
 0x1d5   : > { %s3202_s5 = sand.u32 (!%p3536_p11), 1, %s3537_s1   ;;  %p3539_p12 = scmp.ne.s32.totalorder (!%p3536_p11), %s3538_s24, 0 }
 0x1d6   : > { %s3205_s10 = sshll.u32 (!%p3536_p11), %s3202_s5, 2  ;;  %s694_s26 = scalar_lea.sflag (!%p3536_p11), [#allocation4], %s3202_s5 }
 0x1d7   : > { %s697_s8 = scalar_lea.vmem [#allocation3], %s3205_s10 }
 0x1d8   : > { %2446 = dma.done.wait (%p3539_p12), %s694_s26, 64  }
 0x1d9   : > { %2448 = vsyncadd (%p3539_p12), %s694_s26, 4294967232  ;;  %s3540_s14 = sld [smem:[#allocation43_spill]]  ;;  %s706_s6 = scalar_lea.vmem [#allocation6], %s3205_s10 }
 0x1df   : > { %s3214_s17 = sand.u32 1, %s3540_s14  }
 0x1e0   : > { %s703_s23 = scalar_lea.sflag [#allocation7], %s3214_s17 }
 0x1e1   : > { %2450 = dma.done.wait (%p3539_p12), %s703_s23, 128  }
 0x1e2   : > { %2452 = vsyncadd (%p3539_p12), %s703_s23, 4294967168  ;;  %s1666_s29 = sshll.u32 %s3202_s5, 3  ;;  %s715_s16 = scalar_lea.vmem [#allocation8], %s3205_s10 }
 0x1e3   : > { %s721_s22 = scalar_lea.sflag [#allocation10], %s3214_s17  ;;  %s3227_s20 = scalar_lea.vmem [#allocation9], %s1666_s29 }
 0x1e4   : > { %2454 = dma.done.wait (%p3539_p12), %s721_s22, 128  }
 0x1e5   : > { %2456 = vsyncadd (%p3539_p12), %s721_s22, 4294967168  ;;  %s3541_s11 = sld [smem:[#allocation45_spill]]  ;;  %s3234_s27 = sand.u32 1, %s2491_s30  }
 0x1e6   : > { %s3237_s4 = sshll.u32 %s3234_s27, 4 }
 0x1e7   : > { %s733_s19 = scalar_lea.vmem [#allocation11], %s3237_s4 }
 0x1eb   : > { %p3542_p10 = scmp.ne.s32.totalorder %s3541_s11, 0 }
 0x1ed   : > { %2458 = dma.done.wait (%p3542_p10), %s721_s22, 256  }
 0x1ee   : > { %2460 = vsyncadd (%p3542_p10), %s721_s22, 4294967040  ;;  %s739_s0 = scalar_lea.sflag [#allocation13], %s3214_s17  ;;  %s741_s12 = scalar_lea.vmem [#allocation12], %s3234_s27 }
 0x1ef   : > { %2462 = dma.done.wait (%p3542_p10), %s739_s0, 272  }
 0x1f0   : > { %2464 = vsyncadd (%p3542_p10), %s739_s0, 4294967024  ;;  %s750_s9 = scalar_lea.vmem [#allocation14], %s3237_s4  ;;  %s756_s7 = scalar_lea.sflag [#allocation16], %s3214_s17 }
 0x1f1   : > { %s758_s1 = scalar_lea.vmem [#allocation15], %s3234_s27 }
 0x1f2   : > { %2466 = dma.done.wait (%p3542_p10), %s756_s7, 272  }
 0x1f3   : > { %2468 = vsyncadd (%p3542_p10), %s756_s7, 4294967024  ;;  %s767_s24 = scalar_lea.vmem [#allocation17], %s3237_s4  ;;  %s773_s26 = scalar_lea.sflag [#allocation19], %s3214_s17 }
 0x1f4   : > { %s775_s23 = scalar_lea.vmem [#allocation18], %s3234_s27 }
 0x1f5   : > { %2470 = dma.done.wait (%p3542_p10), %s773_s26, 80  }
 0x1f6   : > { %2472 = vsyncadd (%p3542_p10), %s773_s26, 4294967216  ;;  %s1670_s22 = sshll.u32 %s3234_s27, 2  ;;  %p3543_p4 = scmp.eq.s32.totalorder %s3540_s14, 0 }
 0x1f7   : > { %s3265_s0 = scalar_lea.vmem [#allocation20], %s1670_s22 }
 0x1f8   : > { %2474 = dma.done.wait (%p3543_p4), [#allocation22], 32   ;;  %p3544_p13 = pmov %p3543_p4 }
 0x1f9   : > { %p3545_p6 = pmov %p3543_p4 }
 0x1fa   : > { %2476 = vsyncadd (%p3544_p13), [#allocation22], 4294967264 }
 0x1fb   : > { %2478 = dma.done.wait (%p3545_p6), [#allocation25], 16   ;;  %p3546_p2 = pmov %p3543_p4 }
 0x1fc   : > { %s3277_s17 = scalar_lea.vmem [#allocation26], %s1666_s29  ;;  %s3547_s11 = sld [smem:[#allocation39_spill]] }
 0x1fd   : > { %2480 = vsyncadd (%p3546_p2), [#allocation25], 4294967280 }
 0x202   : > { %p1675_p1 = scmp.ne.s32.totalorder %s3547_s11, 0 }
 0x203   : > { %vm893_vm0 = vcmask (!%p1675_p1), 261120   ;;  %v2545_v0 = vmov (!%p1675_p1), 0.0  }
 0x204   : > { %892 = sbr.rel (%p1675_p1) target bundleno = 523 (0x20b), region = 136  ;;  %894 = vst.msk [vmem:[#allocation2] sm:$0xff] (!%p1675_p1), %vm893_vm0, %v2545_v0 }
 0x20b PF: > { %v1947_v1 = vld [vmem:[%s750_s9] sm:$0xff]   ;;  %v2546_v2 = vmov 0.0   ;;  %v1948_v3 = vld [vmem:[%s750_s9 + $0x8] sm:$0xff]   ;;  %vm2547_vm1 = vmmov 0   ;;  %vm919_vm2 = vcmask 261120   ;;  %vm1099_vm3 = vcmask 64512  }
 0x20c   : > { %1725 = vmatprep.subr.bf16.mxu1 %v2546_v2  ;;  %1717 = vmatprep.subr.bf16.mxu0 %v2546_v2  ;;  %v1949_v4 = vld [vmem:[%s733_s19] sm:$0xff]   ;;  %v1950_v5 = vld [vmem:[%s733_s19 + $0x8] sm:$0xff]   ;;  %vm1162_vm4 = vcmask 1043456   ;;  %s3548_s10 = sld [smem:[#allocation39_spill]] }
 0x20d   : > { %1726 = vmatpush3.bf16.msra.mxu1 %v1947_v1  ;;  %1729 = vmatprep.mubr.msk.bf16.mxu1 %vm2547_vm1, %v2546_v2  ;;  %v963_v6 = vld [vmem:[%s706_s6] sm:$0xf]  ;;  %v895_v7 = vld [vmem:[%s697_s8] sm:$0xf]  ;;  %v1680_v8 = vld [vmem:[%s758_s1] ss:$0 sm:$0xff] }
 0x20e   : > { %1727 = vmatprep.subr.bf16.mxu1 %v2546_v2  ;;  %1721 = vmatprep.mubr.msk.bf16.mxu0 %vm2547_vm1, %v2546_v2  ;;  %v1676_v13 = vld [vmem:[%s741_s12] ss:$0 sm:$0xff]  ;;  %v1951_v23 = vld [vmem:[%s767_s24] sm:$0xff]  }
 0x20f   : > { %1718 = vmatpush3.bf16.msra.mxu0 %v1949_v4  ;;  %v1952_v24 = vld [vmem:[%s767_s24 + $0x8] sm:$0xff]   ;;  %v1030_v25 = vld [vmem:[%s715_s16] sm:$0xf] }
 0x210   : > { %1719 = vmatprep.subr.bf16.mxu0 %v2546_v2  ;;  %v1684_v39 = vld [vmem:[%s775_s23] ss:$0 sm:$0xff]  ;;  %v1208_v44 = vld [vmem:[%s3265_s0] sm:$0xf] }
 0x211   : > { %1728 = vmatpush3.bf16.msra.mxu1 %v1948_v3  ;;  %v1213_v45 = vsel %vm1162_vm4, %v1208_v44, 0  ;;  %v1206_v55 = vld [vmem:[#allocation2] sm:$0xff] }
 0x212   : > { %1741 = vmatprep.subr.bf16.mxu1 %v2546_v2  ;;  %p1691_p7 = scmp.ne.s32.totalorder %s3548_s10, 3 }
 0x213   : > { %1720 = vmatpush3.bf16.msra.mxu0 %v1950_v5  ;;  %v1261_v61 = vld [vmem:[%s3227_s20] sm:$0xff] (!%p1691_p7)  ;;  %v1692_v63 = vld [vmem:[#allocation21] ss:$0 sm:$0xff] (!%p1691_p7) }
 0x214   : > { %1730 = vmatmul.mubr.msk.bf16.vlgmr.msra.gmra.mrb[0].mxu1 %vm919_vm2, %v963_v6  ;;  %1733 = vmatprep.subr.bf16.mxu0 %v2546_v2 }
 0x215   : > { %1743 = vmatprep.mubr.msk.bf16.mxu1 %vm2547_vm1, %v2546_v2 }
 0x216   : > { %1722 = vmatmul.mubr.msk.bf16.vlgmr.msra.gmra.mrb[0].mxu0 %vm919_vm2, %v895_v7 }
 0x217   : > { %1737 = vmatprep.mubr.msk.bf16.mxu0 %vm2547_vm1, %v2546_v2  ;;  %1734 = vmatpush3.bf16.msra.mxu0 %v1951_v23 }
 0x218   : > { %1735 = vmatprep.subr.bf16.mxu0 %v2546_v2 }
 0x21b   : > { %1736 = vmatpush3.bf16.msra.mxu0 %v1952_v24 }
 0x21c   : > { %1747 = vmatprep.subr.bf16.mxu0 %v2546_v2 }
 0x21e   : > { %1738 = vmatmul.mubr.msk.bf16.vlgmr.msra.gmra.mrb[4].mxu0 %vm919_vm2, %v1030_v25 }
 0x21f   : > { %1749 = vmatprep.mubr.msk.bf16.mxu0 %vm2547_vm1, %v2546_v2 }
 0x2e7   : > { %v1024_v9 = vpop.f32.mrb[0].mxu1 }
 0x2e8   : > { %v1025_v10 = vadd.f32 %v1680_v8, %v1024_v9  ;;  %v1731_v11 = vpop.f32.mrb[1].mxu1 }
 0x2e9   : > { %v1027_v12 = vpop.f32.mrb[2].mxu1  ;;  %v957_v14 = vpop.f32.mrb[0].mxu0 }
 0x2ea   : > { %v1098_v15 = vpack.c.bf16 %v1025_v10, %v1025_v10  ;;  %v1732_v16 = vpop.f32.mrb[3].mxu1  ;;  %v1723_v17 = vpop.f32.mrb[1].mxu0  ;;  %v958_v20 = vadd.f32 %v1676_v13, %v957_v14  ;;  %v1693_v12 = vld [vmem:[#allocation23] ss:$0 sm:$0xff] (!%p1691_p7)  ;;  %v1694_v14 = vld [vmem:[#allocation24] ss:$0 sm:$0xff] (!%p1691_p7) }
 0x2eb   : > { %v960_v18 = vpop.f32.mrb[2].mxu0 }
 0x2ec   : > { %v1104_v19 = vsel %vm1099_vm3, %v1098_v15, 0  ;;  %v1724_v21 = vpop.f32.mrb[3].mxu0  ;;  %v1097_v22 = vpack.c.bf16 %v958_v20, %v958_v20 }
 0x2ed   : > { %1742 = vmatpush3.bf16.xpose.msra.mxu1 %v1104_v19 }
 0x2ee   : > { %1753 = vmatprep.subr.bf16.mxu1 %v2546_v2 }
 0x2f1   : > { %v1091_v36 = vpop.f32.mrb[4].mxu0 }
 0x2f2   : > { %v1739_v37 = vpop.f32.mrb[5].mxu0  ;;  %v1092_v41 = vadd.f32 %v1684_v39, %v1091_v36 }
 0x2f3   : > { %v1094_v38 = vpop.f32.mrb[6].mxu0 }
 0x2f4   : > { %1744 = vmatmul.mubr.msk.bf16.vlgmr.msra.gmra.mrb[4].mxu1 %vm1099_vm3, %v1097_v22  ;;  %v1740_v40 = vpop.f32.mrb[7].mxu0  ;;  %v1158_v42 = vpack.c.bf16 %v1092_v41, %v1092_v41 }
 0x2f5   : > { %1755 = vmatprep.mubr.msk.bf16.mxu1 %vm2547_vm1, %v2546_v2  ;;  %1754 = vmatpush3.bf16.msra.mxu1 %v1213_v45 }
 0x2f6   : > { %v1164_v43 = vsel %vm1162_vm4, %v1158_v42, 0 }
 0x2f7   : > { %1748 = vmatpush3.bf16.msra.mxu0 %v1164_v43 }
 0x3c7   : > { %v1140_v26 = vpop.f32.mrb[4].mxu1 }
 0x3c8   : > { %v1745_v27 = vpop.f32.mrb[5].mxu1  ;;  %v1146_v28 = vsel %vm1099_vm3, %v1140_v26, -inf }
 0x3c9   : > { %1147 = vmax.xlane.f32.xlu0 %v1146_v28  ;;  %v1143_v29 = vpop.f32.mrb[6].mxu1 }
 0x3ca   : > { %v1746_v30 = vpop.f32.mrb[7].mxu1 }
 0x456   : > { %v1148_v31 = vpop.xlane.xlu0 %1147 }
 0x457   : > { %v1149_v32 = vsub.f32 %v1140_v26, %v1148_v31 }
 0x459   : > { %v1150_v33 = vmul.f32 1.442695, %v1149_v32 }
 0x45b   : > { %1953 = vpow2.f32 %v1150_v33 }
 0x465   : > { %v1954_v34 = vpop.eup %1953 }
 0x466   : > { %v1152_v35 = vsel %vm1099_vm3, %v1954_v34, 0.0 }
 0x467   : > { %1153 = vadd.xlane.f32.xlu0 %v1152_v35 }
 0x4f4   : > { %v1154_v46 = vpop.xlane.xlu0 %1153 }
 0x4f5   : > { %1955 = vrcp.f32 %v1154_v46 }
 0x4ff   : > { %v1956_v47 = vpop.eup %1955 }
 0x500   : > { %v1156_v48 = vmul.f32 %v1956_v47, %v1954_v34 }
 0x502   : > { %v1157_v49 = vpack.c.bf16 %v1156_v48, %v1156_v48 }
 0x504   : > { %1750 = vmatmul.mubr.msk.bf16.vlgmr.msra.gmra.mrb[8].mxu0 %vm1099_vm3, %v1157_v49 }
 0x5d7   : > { %v1200_v50 = vpop.f32.mrb[8].mxu0 }
 0x5d8   : > { %v1207_v51 = vpack.c.bf16 %v1200_v50, %v1200_v50  ;;  %v1751_v52 = vpop.f32.mrb[9].mxu0 }
 0x5d9   : > { %v1203_v53 = vpop.f32.mrb[10].mxu0 }
 0x5da   : > { %v1752_v54 = vpop.f32.mrb[11].mxu0  ;;  %1756 = vmatmul.mubr.msk.bf16.vlgmr.msra.gmra.mrb[8].mxu1 %vm1099_vm3, %v1207_v51 }
 0x6aa   : > { %1260 = sbr.rel (%p1691_p7) target bundleno = 2038 (0x7f6), region = 140 }
 0x6ad   : > { %v1249_v56 = vpop.f32.mrb[8].mxu1 }
 0x6ae   : > { %v1255_v57 = vadd.f32 %v1249_v56, %v1206_v55  ;;  %v1757_v58 = vpop.f32.mrb[9].mxu1 }
 0x6af   : > { %v1252_v59 = vpop.f32.mrb[10].mxu1 }
 0x6b0   : > { %1256 = vst.msk [vmem:[#allocation2] sm:$0xff] %vm919_vm2, %v1255_v57  ;;  %v1758_v60 = vpop.f32.mrb[11].mxu1 }
 0x6b7   : > { %v1262_v62 = vld [vmem:[#allocation2] sm:$0xff] }
 0x6b8   : > { %v1263_v0 = vadd.f32 %v1262_v62, %v1261_v61 }
 0x6ba   : > { %v1271_v1 = vadd.f32 %v1692_v63, %v1263_v0 }
 0x6bc   : > { %v1272_v2 = vsel %vm919_vm2, %v1271_v1, 0.0 }
 0x6bd   : > { %1273 = vadd.xlane.f32.xlu0 %v1272_v2 }
 0x74a   : > { %v1274_v3 = vpop.xlane.xlu0 %1273 }
 0x74b   : > { %v1276_v4 = vmul.f32 0.03125, %v1274_v3 }
 0x74d   : > { %v1277_v5 = vsub.f32 %v1271_v1, %v1276_v4 }
 0x74f   : > { %v1278_v6 = vmul.f32 %v1277_v5, %v1277_v5 }
 0x751   : > { %v1279_v7 = vsel %vm919_vm2, %v1278_v6, 0.0 }
 0x752   : > { %1280 = vadd.xlane.f32.xlu0 %v1279_v7 }
 0x7df   : > { %v1281_v8 = vpop.xlane.xlu0 %1280 }
 0x7e0   : > { %v1282_v9 = vmul.f32 0.03125, %v1281_v8 }
 0x7e2   : > { %v1283_v10 = vadd.f32 1e-05, %v1282_v9 }
 0x7e4   : > { %1957 = vrsqrt.f32 %v1283_v10 }
 0x7ee   : > { %v1958_v11 = vpop.eup %1957 }
 0x7ef   : > { %v1285_v13 = vmul.f32 %v1958_v11, %v1277_v5 }
 0x7f1   : > { %v1293_v15 = vmul.f32 %v1693_v12, %v1285_v13 }
 0x7f3   : > { %v1301_v16 = vadd.f32 %v1694_v14, %v1293_v15 }
 0x7f5   : > { %1302 = vst.msk [vmem:[%s3277_s17] sm:$0xff] %vm919_vm2, %v1301_v16 }
 0x7f6 PF: > { %s3549_s8 = sld [smem:[#allocation40_spill]]  ;;  %s3550_s14 = sld [smem:[#allocation48_spill]] }
 0x7f7   : > { %s3551_s20 = sld [smem:[#allocation66_spill]]  ;;  %s1317_s19 = sshll.u32 %s3277_s17, 4  ;;  %s1318_s19 = int_to_ptr.vmem [resolvable:$true] %s1317_s19 }
 0x7f8   : > { %s1304_s12 = scalar_lea.sflag [#allocation5], %s3202_s5  ;;  %s2373_s9 = scalar_lea.vmem %s1318_s19, 128 }
 0x7f9   : > { %p2374_p8 = scmp.ne.s32.totalorder %s1318_s19, %s2373_s9  ;;  %s2548_s7 = smov [#allocation26]  }
 0x7fa   : > { %s2377_s1 = sshll.u32 %s2548_s7, 4  ;;  %s2378_s1 = int_to_ptr.vmem [resolvable:$false] %s2377_s1 }
 0x7fb   : > { %s2379_s24 = scalar_lea.vmem %s2378_s1, 256  ;;  %p2380_p3 = scmp.lt.s32.totalorder %s1318_s19, %s2378_s1 }
 0x7fc   : > { %s1696_s6 = sshll.u32 %s3549_s8, 7  ;;  %p3553_p9 = scmp.ne.s32.totalorder %s3550_s14, 0 }
 0x7fd   : > { %s3552_s27 = smov %s3551_s20  ;;  %s3327_s4 = scalar_lea.hbm %s3551_s20, %s1696_s6 }
 0x7fe   : > { %p2375_p5 = pnand %p2374_p8, %p3553_p9  ;;  %p2381_p11 = scmp.lt.s32.totalorder %s2379_s24, %s2373_s9 }
 0x800   : > { %p2376_p0 = pneg %p2375_p5  ;;  %p2382_p12 = por %p2381_p11, %p2380_p3 }
 0x802   : > { %p2383_p10 = pnand %p2382_p12, %p2376_p0 }
 0x804   : > { %2386 = shalt.err (!%p2383_p10)
}
 0x805   : > { %s2387_s5 = scalar_lea.hbm %s3327_s4, 128  ;;  %s2391_s22 = scalar_lea.hbm %s3552_s27, 256 }
 0x806   : > { %p2388_p4 = scmp.ne.s32.totalorder %s3327_s4, %s2387_s5  ;;  %p2392_p2 = scmp.lt.u32.totalorder %s3327_s4, %s3552_s27 }
 0x807   : > { %p2393_p1 = scmp.lt.u32.totalorder %s2391_s22, %s2387_s5  ;;  %p2395_p8 = scmp.lt.u32.totalorder %s2387_s5, %s3327_s4 }
 0x808   : > { %p2389_p13 = pnand %p2388_p4, %p3553_p9 }
 0x809   : > { %p2394_p7 = por %p2393_p1, %p2392_p2 }
 0x80a   : > { %p2390_p6 = pneg %p2389_p13 }
 0x80b   : > { %p2396_p5 = por %p2395_p8, %p2394_p7 }
 0x80d   : > { %p2397_p0 = pnand %p2396_p5, %p2390_p6 }
 0x80f   : > { %2400 = shalt.err (!%p2397_p0)
}
 0x810   : > { %1793 = dma.vmem_to_hbm [thread:$0]  (%p3553_p9), %s1318_s19, 128, %s3327_s4, %s1304_s12  }
 0x811 PF: > { %s3554_s11 = sld [smem:[#allocation42_spill]]  ;;  %s3555_s10 = sld [smem:[#allocation37_spill]] }
 0x812   : > { %s3556_s8 = sld [smem:[#allocation46_spill]] }
 0x817   : > { %p1850_p3 = scmp.ge.s32.totalorder %s3554_s11, 2  ;;  %s1329_s6 = sand.u32 1, %s3555_s10  }
 0x818   : > { %p3557_p11 = scmp.ne.s32.totalorder %s3556_s8, 0  ;;  %s1330_s29 = scalar_lea.sflag [#allocation5], %s1329_s6 }
 0x81a   : > { %p1840_p12 = pnand %p1850_p3, %p3557_p11 }
 0x81c   : > { %2482 = dma.done.wait (!%p1840_p12), %s1330_s29, 128  }
 0x81d   : > { %2484 = vsyncadd (!%p1840_p12), %s1330_s29, 4294967168  ;;  %s47_s23 = sadd.s32 1, %s3554_s11   ;;  %s3558_s16 = sld [smem:[#allocation38_spill]] }
 0x81e   : > { %p44_p10 = scmp.ge.s32.totalorder %s47_s23, 10   ;;  %s3559_s14 = sld [smem:[#allocation52_spill]] }
 0x81f   : > { %s3560_s20 = sld [smem:[#allocation41_spill]]  ;;  %s3561_s4 = sld [smem:[#allocation50_spill]] }
 0x820   : > { %s3562_s22 = sld [smem:[#allocation51_spill]]  ;;  %s3563_s29 = smov %s2491_s30 }
 0x821   : > { %s3564_s30 = smov %s2495_s15  ;;  %s3565_s15 = smov %s2869_s2 }
 0x822   : > { %s3566_s17 = smov %s2507_s18  ;;  %s3568_s19 = smov %s2519_s21 }
 0x823   :  { %46 = sbr.rel (!%p44_p10) target bundleno = 36 (0x24), region = 261 }
 0x824   : > { %s3567_s18 = smov %s3559_s14 }
 0x825   : > { %s3569_s21 = smov %s3561_s4 }
 0x82a   :  { %1335 = vsyncpa [#allocation4], 1 }
 0x82b   :  { %1337 = vsyncpa [#allocation4 + $0x1], 1 }
 0x82c   :  { %1338 = vsyncpa [#allocation7], 1 }
 0x82d   :  { %1340 = vsyncpa [#allocation7 + $0x1], 1 }
 0x82e   :  { %1341 = vsyncpa [#allocation10], 1 }
 0x82f   :  { %1343 = vsyncpa [#allocation10 + $0x1], 1 }
 0x830   :  { %1344 = vsyncpa [#allocation13], 1 }
 0x831   :  { %1346 = vsyncpa [#allocation13 + $0x1], 1 }
 0x832   :  { %1347 = vsyncpa [#allocation16], 1 }
 0x833   :  { %1349 = vsyncpa [#allocation16 + $0x1], 1 }
 0x834   :  { %1350 = vsyncpa [#allocation19], 1 }
 0x835   :  { %1352 = vsyncpa [#allocation19 + $0x1], 1 }
 0x836   :  { %1353 = vsyncpa [#allocation22], 1 }
 0x837   :  { %1354 = vsyncpa [#allocation25], 1 }
 0x838   :  { %1355 = vsyncpa [#allocation5], 1 }
 0x839   :  { %1357 = vsyncpa [#allocation5 + $0x1], 1 }

</bundles_post_ra>
